<compile_context>
chip_gen: v5e
topology: v5e:2x2
jax: 0.10.0
libtpu: 0.0.40
codegen_flags: <defaults>
</compile_context>

<pallas_src>
import math
import numpy as np
import jax
import jax.numpy as jnp
from jax.experimental import pallas as pl
from jax.experimental.pallas import tpu as pltpu

C_IN = 3          # image channels
CNN_CH1 = 6       # conv1 output channels
CNN_CH2 = 12      # conv2 output channels == CNN feature dim
NTAP = 9          # 3x3 window taps
P1_OUT = 7        # maxpool1 output spatial size (7x7)
NP1 = P1_OUT * P1_OUT   # 49


# --------------------- constant index tables (host / numpy) ------------------

def _conv1_gather_indices():
    """Padded-input (34x34) coords for conv1 evaluated at every
    (pool1 tap t, pool1 output o) position.  Shapes (9, 9, 49) = (t, conv tap j, o)."""
    kh, kw = np.meshgrid(np.arange(3), np.arange(3), indexing="ij")   # pool1 taps
    kh, kw = kh.reshape(-1), kw.reshape(-1)
    jh, jw = np.meshgrid(np.arange(3), np.arange(3), indexing="ij")   # conv1 taps
    jh, jw = jh.reshape(-1), jw.reshape(-1)
    oh, ow = np.meshgrid(np.arange(P1_OUT), np.arange(P1_OUT), indexing="ij")
    oh, ow = oh.reshape(-1), ow.reshape(-1)
    # conv1 output position feeding pool1 tap t at pool1 output o is
    # (2*oh+kh, 2*ow+kw); its receptive field in the 1-padded input is
    # (2*(2*oh+kh)+jh, 2*(2*ow+kw)+jw).
    rows_h = 2 * (2 * oh[None, None, :] + kh[:, None, None]) + jh[None, :, None]
    rows_w = 2 * (2 * ow[None, None, :] + kw[:, None, None]) + jw[None, :, None]
    return rows_h, rows_w


def _conv2_selection():
    """0/1 selection matrices S2[t] (49, 9): map the flattened maxpool1 output
    (7x7) to the conv2 tap-t input needed at the 9 conv2 output positions that
    feed maxpool2 (pad=1 / stride=2 folded in; padded taps stay all-zero)."""
    s2 = np.zeros((NTAP, NP1, 9), np.float32)
    for kh2 in range(3):
        for kw2 in range(3):
            t = kh2 * 3 + kw2
            for h in range(3):
                for w in range(3):
                    u = h * 3 + w
                    ih, iw = 2 * h + kh2 - 1, 2 * w + kw2 - 1
                    if 0 <= ih < P1_OUT and 0 <= iw < P1_OUT:
                        s2[t, ih * P1_OUT + iw, u] = 1.0
    return s2


_ROWS_H, _ROWS_W = _conv1_gather_indices()
_S2 = _conv2_selection()


# ------------------------------ fused kernel ---------------------------------

def _cnn_fm_kernel(p1x_ref, emb_ref, w1_ref, b1_ref, s2_ref, w2t_ref, b2_ref,
                   vte_ref, vtf_ref, v2te_ref, v2tf_ref, wle_ref, wlf_ref,
                   bl_ref, o_ref):
    f32 = jnp.float32
    w1 = w1_ref[...]                      # (6, 27)
    b1 = b1_ref[...]                      # (6, 1)

    # conv1 (3->6, k3 s2 p1) + ReLU + maxpool1 (k3 s2): per pool tap evaluate
    # conv1 at the 49 pool-output positions, then VPU max-tree over the 9 taps.
    y2 = None
    for t in range(NTAP):
        yt = jnp.dot(w1, p1x_ref[0, t], preferred_element_type=f32) + b1   # (6, 49)
        yt = jnp.maximum(yt, 0.0)
        y2 = yt if y2 is None else jnp.maximum(y2, yt)                     # (6, 49)

    # conv2 (6->12, k3 s2 p1) + ReLU, only at the 9 positions maxpool2 uses;
    # pad/stride patch extraction = constant 0/1 selection matmul.
    acc = None
    for t in range(NTAP):
        p2t = jnp.dot(y2, s2_ref[t], preferred_element_type=f32)           # (6, 9)
        ct = jnp.dot(w2t_ref[t], p2t, preferred_element_type=f32)          # (12, 9)
        acc = ct if acc is None else acc + ct
    y3 = jnp.maximum(acc + b2_ref[...], 0.0)                               # (12, 9)

    # maxpool2: reduce the 9 window positions -> CNN feature column.
    y4 = jnp.max(y3, axis=-1, keepdims=True)                               # (12, 1)

    # FactorizationMachine (column orientation), split into embedding / CNN
    # contributions (mathematically identical to concatenating the features).
    e = emb_ref[0]                                                         # (2E, 1)
    lin = (jnp.dot(wle_ref[...], e, preferred_element_type=f32)
           + jnp.dot(wlf_ref[...], y4, preferred_element_type=f32)
           + bl_ref[...])                                                  # (1, 1)
    xv = (jnp.dot(vte_ref[...], e, preferred_element_type=f32)
          + jnp.dot(vtf_ref[...], y4, preferred_element_type=f32))         # (L, 1)
    x2v2 = (jnp.dot(v2te_ref[...], e * e, preferred_element_type=f32)
            + jnp.dot(v2tf_ref[...], y4 * y4, preferred_element_type=f32)) # (L, 1)
    # NOTE: '+' between the two second-order terms, exactly as in the source.
    o_ref[0] = lin + 0.5 * jnp.sum(xv * xv + x2v2, axis=0, keepdims=True)  # (1, 1)


# ------------------------------ forward wrapper -------------------------------

def cnn_fm_forward(user_isbn_vector, img_vector, params):
    B = img_vector.shape[0]
    E2 = 2 * params["embedding"].shape[1]     # flattened user+isbn embedding dim
    L = params["fm_v"].shape[1]

    # ---- glue: embedding gather + pool1-expanded im2col of the input image ----
    idx = user_isbn_vector + params["offsets"][None, :]
    emb = jnp.take(params["embedding"], idx, axis=0).reshape(B, E2, 1)

    xpad = jnp.pad(img_vector, ((0, 0), (0, 0), (1, 1), (1, 1)))        # (B,3,34,34)
    p1x = xpad[:, :, _ROWS_H, _ROWS_W]                                  # (B,3,9,9,49)
    p1x = p1x.transpose(0, 2, 1, 3, 4).reshape(B, NTAP, C_IN * NTAP, NP1)

    # ---- weight repacking (one-time reshapes, matches torch layouts) ----
    w1 = params["conv1_w"].reshape(CNN_CH1, C_IN * NTAP)                # (6, 27)
    b1 = params["conv1_b"].reshape(CNN_CH1, 1)
    w2t = jnp.transpose(params["conv2_w"], (2, 3, 0, 1)).reshape(NTAP, CNN_CH2, CNN_CH1)
    b2 = params["conv2_b"].reshape(CNN_CH2, 1)
    s2 = jnp.asarray(_S2)
    v = params["fm_v"]
    vte, vtf = v[:E2].T, v[E2:].T
    v2 = v * v
    v2te, v2tf = v2[:E2].T, v2[E2:].T
    wle, wlf = params["fm_w"][:, :E2], params["fm_w"][:, E2:]
    bl = params["fm_b"]

    out = pl.pallas_call(
        _cnn_fm_kernel,
        out_shape=jax.ShapeDtypeStruct((B, 1, 1), jnp.float32),
        grid=(B,),
        in_specs=[
            pl.BlockSpec((1, NTAP, C_IN * NTAP, NP1), lambda i: (i, 0, 0, 0)),  # p1x
            pl.BlockSpec((1, E2, 1), lambda i: (i, 0, 0)),                      # emb
            pl.BlockSpec((CNN_CH1, C_IN * NTAP), lambda i: (0, 0)),             # w1
            pl.BlockSpec((CNN_CH1, 1), lambda i: (0, 0)),                       # b1
            pl.BlockSpec((NTAP, NP1, 9), lambda i: (0, 0, 0)),                  # s2
            pl.BlockSpec((NTAP, CNN_CH2, CNN_CH1), lambda i: (0, 0, 0)),        # w2t
            pl.BlockSpec((CNN_CH2, 1), lambda i: (0, 0)),                       # b2
            pl.BlockSpec((L, E2), lambda i: (0, 0)),                            # vte
            pl.BlockSpec((L, CNN_CH2), lambda i: (0, 0)),                       # vtf
            pl.BlockSpec((L, E2), lambda i: (0, 0)),                            # v2te
            pl.BlockSpec((L, CNN_CH2), lambda i: (0, 0)),                       # v2tf
            pl.BlockSpec((1, E2), lambda i: (0, 0)),                            # wle
            pl.BlockSpec((1, CNN_CH2), lambda i: (0, 0)),                       # wlf
            pl.BlockSpec((1, 1), lambda i: (0, 0)),                             # bl
        ],
        out_specs=pl.BlockSpec((1, 1, 1), lambda i: (i, 0, 0)),
        compiler_params=pltpu.CompilerParams(
            dimension_semantics=("parallel",),
            vmem_limit_bytes=32 * 1024 * 1024,
        ),
    )(p1x, emb, w1, b1, s2, w2t, b2, vte, vtf, v2te, v2tf, wle, wlf, bl)
    return out[:, 0, 0]


# ------------------------------- parameters -----------------------------------

def make_params(key, n_user, n_isbn, embed_dim, latent_dim):
    ks = jax.random.split(key, 6)
    n_vocab = n_user + n_isbn
    input_dim = embed_dim * 2 + CNN_CH2

    def xavier_uniform(k, shape, fan_in, fan_out):
        bound = math.sqrt(6.0 / (fan_in + fan_out))
        return jax.random.uniform(k, shape, jnp.float32, -bound, bound)

    def xavier_normal(k, shape, fan_in, fan_out):
        std = math.sqrt(2.0 / (fan_in + fan_out))
        return std * jax.random.normal(k, shape, jnp.float32)

    return {
        "offsets": jnp.array([0, n_user], dtype=jnp.int32),
        "embedding": xavier_uniform(ks[0], (n_vocab, embed_dim), n_vocab, embed_dim),
        "conv1_w": xavier_uniform(ks[1], (CNN_CH1, C_IN, 3, 3), C_IN * 9, CNN_CH1 * 9),
        "conv1_b": jnp.zeros((CNN_CH1,), jnp.float32),
        "conv2_w": xavier_uniform(ks[2], (CNN_CH2, CNN_CH1, 3, 3), CNN_CH1 * 9, CNN_CH2 * 9),
        "conv2_b": jnp.zeros((CNN_CH2,), jnp.float32),
        "fm_v": jax.random.uniform(ks[3], (input_dim, latent_dim), jnp.float32),  # torch.rand
        "fm_w": xavier_normal(ks[4], (1, input_dim), input_dim, 1),
        "fm_b": jnp.zeros((1, 1), jnp.float32),
    }


# ------------------------------ numpy reference --------------------------------

def _np_conv2d(x, w, b, stride, pad):
    B, C, H, W = x.shape
    OC, _, K, _ = w.shape
    xp = np.pad(x, ((0, 0), (0, 0), (pad, pad), (pad, pad)))
    OH = (H + 2 * pad - K) // stride + 1
    OW = (W + 2 * pad - K) // stride + 1
    out = np.zeros((B, OC, OH, OW), x.dtype)
    for kh in range(K):
        for kw in range(K):
            xs = xp[:, :, kh:kh + stride * OH:stride, kw:kw + stride * OW:stride]
            out += np.einsum("bchw,oc->bohw", xs, w[:, :, kh, kw])
    return out + b[None, :, None, None]


def _np_maxpool(x, K, stride):
    B, C, H, W = x.shape
    OH = (H - K) // stride + 1
    OW = (W - K) // stride + 1
    out = np.full((B, C, OH, OW), -np.inf, x.dtype)
    for kh in range(K):
        for kw in range(K):
            out = np.maximum(out, x[:, :, kh:kh + stride * OH:stride,
                                    kw:kw + stride * OW:stride])
    return out


def reference_forward(user_isbn_vector, img_vector, params):
    """Pure numpy float64 reference reproducing the PyTorch module exactly."""
    p = {k: np.asarray(v) for k, v in params.items()}
    img = np.asarray(img_vector, np.float64)
    idx = np.asarray(user_isbn_vector) + p["offsets"][None, :]
    emb = p["embedding"].astype(np.float64)[idx]                        # (B,2,E)
    B = img.shape[0]

    y = np.maximum(_np_conv2d(img, p["conv1_w"].astype(np.float64),
                              p["conv1_b"].astype(np.float64), 2, 1), 0.0)
    y = _np_maxpool(y, 3, 2)
    y = np.maximum(_np_conv2d(y, p["conv2_w"].astype(np.float64),
                              p["conv2_b"].astype(np.float64), 2, 1), 0.0)
    y = _np_maxpool(y, 3, 2)
    feat = y.reshape(B, -1)

    x = np.concatenate([emb.reshape(B, -1), feat], axis=1)
    v = p["fm_v"].astype(np.float64)
    lin = x @ p["fm_w"].astype(np.float64).T + p["fm_b"].astype(np.float64)
    square_of_sum = (x @ v) ** 2
    sum_of_square = (x ** 2) @ (v ** 2)
    out = lin + 0.5 * np.sum(square_of_sum + sum_of_square, axis=1, keepdims=True)
    return out[:, 0]


# ----------------------------------- main --------------------------------------

if __name__ == "__main__":
    # 32x32 image -> conv/pool chain -> 12 flat CNN features, so cnn_latent_dim = 12
    # cnn_embed_dim = 16  => FM input dim = 2*16 + 12 = 44
    B = 2
    N_USER, N_ISBN = 10, 20
    EMBED_DIM = 16
    LATENT_DIM = 12

    key = jax.random.PRNGKey(0)
    k_par, k_uid, k_iid, k_img = jax.random.split(key, 4)
    params = make_params(k_par, N_USER, N_ISBN, EMBED_DIM, LATENT_DIM)

    user_ids = jax.random.randint(k_uid, (B, 1), 0, N_USER, dtype=jnp.int32)
    isbn_ids = jax.random.randint(k_iid, (B, 1), 0, N_ISBN, dtype=jnp.int32)
    user_isbn_vector = jnp.concatenate([user_ids, isbn_ids], axis=1)    # (B, 2)
    img_vector = jax.random.normal(k_img, (B, 3, 32, 32), jnp.float32)

    fwd = jax.jit(cnn_fm_forward)
    out = jax.block_until_ready(fwd(user_isbn_vector, img_vector, params))
    assert out.shape == (B,) and out.dtype == jnp.float32

    ref = reference_forward(user_isbn_vector, img_vector, params)
    np.testing.assert_allclose(np.asarray(out), ref, rtol=5e-2, atol=5e-2)
    print("KERNEL_OK")
</pallas_src>

<mosaic_0001>
module attributes {stable_mosaic.version = 11 : i64} {
  func.func @_cnn_fm_kernel(%arg0: i32, %arg1: memref<1x9x27x49xf32, #tpu.memory_space<vmem>>, %arg2: memref<1x32x1xf32, #tpu.memory_space<vmem>>, %arg3: memref<6x27xf32, #tpu.memory_space<vmem>>, %arg4: memref<6x1xf32, #tpu.memory_space<vmem>>, %arg5: memref<9x49x9xf32, #tpu.memory_space<vmem>>, %arg6: memref<9x12x6xf32, #tpu.memory_space<vmem>>, %arg7: memref<12x1xf32, #tpu.memory_space<vmem>>, %arg8: memref<12x32xf32, #tpu.memory_space<vmem>>, %arg9: memref<12x12xf32, #tpu.memory_space<vmem>>, %arg10: memref<12x32xf32, #tpu.memory_space<vmem>>, %arg11: memref<12x12xf32, #tpu.memory_space<vmem>>, %arg12: memref<1x32xf32, #tpu.memory_space<vmem>>, %arg13: memref<1x12xf32, #tpu.memory_space<vmem>>, %arg14: memref<1x1xf32, #tpu.memory_space<vmem>>, %arg15: memref<1x1x1xf32, #tpu.memory_space<vmem>>) attributes {dimension_semantics = [#tpu.dimension_semantics<parallel>], iteration_bounds = array<i64: 2>, scalar_prefetch = 0 : i64, scratch_operands = 0 : i64, tpu.core_type = #tpu.core_type<tc>, window_params = [{transform_indices = @transform_0, window_bounds = array<i64: 1, 9, 27, 49>}, {transform_indices = @transform_1, window_bounds = array<i64: 1, 32, 1>}, {pipeline_mode = #tpu.pipeline_mode<synchronous>, transform_indices = @transform_2, window_bounds = array<i64: 6, 27>}, {pipeline_mode = #tpu.pipeline_mode<synchronous>, transform_indices = @transform_3, window_bounds = array<i64: 6, 1>}, {pipeline_mode = #tpu.pipeline_mode<synchronous>, transform_indices = @transform_4, window_bounds = array<i64: 9, 49, 9>}, {pipeline_mode = #tpu.pipeline_mode<synchronous>, transform_indices = @transform_5, window_bounds = array<i64: 9, 12, 6>}, {pipeline_mode = #tpu.pipeline_mode<synchronous>, transform_indices = @transform_6, window_bounds = array<i64: 12, 1>}, {pipeline_mode = #tpu.pipeline_mode<synchronous>, transform_indices = @transform_7, window_bounds = array<i64: 12, 32>}, {pipeline_mode = #tpu.pipeline_mode<synchronous>, transform_indices = @transform_8, window_bounds = array<i64: 12, 12>}, {pipeline_mode = #tpu.pipeline_mode<synchronous>, transform_indices = @transform_9, window_bounds = array<i64: 12, 32>}, {pipeline_mode = #tpu.pipeline_mode<synchronous>, transform_indices = @transform_10, window_bounds = array<i64: 12, 12>}, {pipeline_mode = #tpu.pipeline_mode<synchronous>, transform_indices = @transform_11, window_bounds = array<i64: 1, 32>}, {pipeline_mode = #tpu.pipeline_mode<synchronous>, transform_indices = @transform_12, window_bounds = array<i64: 1, 12>}, {pipeline_mode = #tpu.pipeline_mode<synchronous>, transform_indices = @transform_13, window_bounds = array<i64: 1, 1>}, {transform_indices = @transform_14, window_bounds = array<i64: 1, 1, 1>}]} {
    %c0 = arith.constant 0 : index
    %c0_0 = arith.constant 0 : index
    %0 = vector.load %arg3[%c0, %c0_0] : memref<6x27xf32, #tpu.memory_space<vmem>>, vector<6x27xf32>
    %c0_1 = arith.constant 0 : index
    %c0_2 = arith.constant 0 : index
    %1 = vector.load %arg4[%c0_1, %c0_2] : memref<6x1xf32, #tpu.memory_space<vmem>>, vector<6x1xf32>
    %c0_3 = arith.constant 0 : index
    %c0_4 = arith.constant 0 : index
    %c0_5 = arith.constant 0 : index
    %c0_6 = arith.constant 0 : index
    %2 = vector.load %arg1[%c0_3, %c0_4, %c0_5, %c0_6] : memref<1x9x27x49xf32, #tpu.memory_space<vmem>>, vector<1x1x27x49xf32>
    %3 = vector.shape_cast %2 : vector<1x1x27x49xf32> to vector<27x49xf32>
    %cst = arith.constant dense<0.000000e+00> : vector<6x49xf32>
    %4 = tpu.matmul %0, %3, %cst {dimension_numbers = #tpu.dot_dimension_numbers<[1], [0], [0], [1], [0, 0, 1, 1], [], []>} : vector<6x27xf32>, vector<27x49xf32>, vector<6x49xf32> -> vector<6x49xf32>
    %5 = vector.broadcast %1 : vector<6x1xf32> to vector<6x49xf32>
    %6 = arith.addf %4, %5 : vector<6x49xf32>
    %cst_7 = arith.constant 0.000000e+00 : f32
    %7 = vector.broadcast %cst_7 : f32 to vector<6x49xf32>
    %8 = arith.maximumf %6, %7 : vector<6x49xf32>
    %c0_8 = arith.constant 0 : index
    %c1 = arith.constant 1 : index
    %c0_9 = arith.constant 0 : index
    %c0_10 = arith.constant 0 : index
    %9 = vector.load %arg1[%c0_8, %c1, %c0_9, %c0_10] : memref<1x9x27x49xf32, #tpu.memory_space<vmem>>, vector<1x1x27x49xf32>
    %10 = vector.shape_cast %9 : vector<1x1x27x49xf32> to vector<27x49xf32>
    %cst_11 = arith.constant dense<0.000000e+00> : vector<6x49xf32>
    %11 = tpu.matmul %0, %10, %cst_11 {dimension_numbers = #tpu.dot_dimension_numbers<[1], [0], [0], [1], [0, 0, 1, 1], [], []>} : vector<6x27xf32>, vector<27x49xf32>, vector<6x49xf32> -> vector<6x49xf32>
    %12 = vector.broadcast %1 : vector<6x1xf32> to vector<6x49xf32>
    %13 = arith.addf %11, %12 : vector<6x49xf32>
    %cst_12 = arith.constant 0.000000e+00 : f32
    %14 = vector.broadcast %cst_12 : f32 to vector<6x49xf32>
    %15 = arith.maximumf %13, %14 : vector<6x49xf32>
    %16 = arith.maximumf %8, %15 : vector<6x49xf32>
    %c0_13 = arith.constant 0 : index
    %c2 = arith.constant 2 : index
    %c0_14 = arith.constant 0 : index
    %c0_15 = arith.constant 0 : index
    %17 = vector.load %arg1[%c0_13, %c2, %c0_14, %c0_15] : memref<1x9x27x49xf32, #tpu.memory_space<vmem>>, vector<1x1x27x49xf32>
    %18 = vector.shape_cast %17 : vector<1x1x27x49xf32> to vector<27x49xf32>
    %cst_16 = arith.constant dense<0.000000e+00> : vector<6x49xf32>
    %19 = tpu.matmul %0, %18, %cst_16 {dimension_numbers = #tpu.dot_dimension_numbers<[1], [0], [0], [1], [0, 0, 1, 1], [], []>} : vector<6x27xf32>, vector<27x49xf32>, vector<6x49xf32> -> vector<6x49xf32>
    %20 = vector.broadcast %1 : vector<6x1xf32> to vector<6x49xf32>
    %21 = arith.addf %19, %20 : vector<6x49xf32>
    %cst_17 = arith.constant 0.000000e+00 : f32
    %22 = vector.broadcast %cst_17 : f32 to vector<6x49xf32>
    %23 = arith.maximumf %21, %22 : vector<6x49xf32>
    %24 = arith.maximumf %16, %23 : vector<6x49xf32>
    %c0_18 = arith.constant 0 : index
    %c3 = arith.constant 3 : index
    %c0_19 = arith.constant 0 : index
    %c0_20 = arith.constant 0 : index
    %25 = vector.load %arg1[%c0_18, %c3, %c0_19, %c0_20] : memref<1x9x27x49xf32, #tpu.memory_space<vmem>>, vector<1x1x27x49xf32>
    %26 = vector.shape_cast %25 : vector<1x1x27x49xf32> to vector<27x49xf32>
    %cst_21 = arith.constant dense<0.000000e+00> : vector<6x49xf32>
    %27 = tpu.matmul %0, %26, %cst_21 {dimension_numbers = #tpu.dot_dimension_numbers<[1], [0], [0], [1], [0, 0, 1, 1], [], []>} : vector<6x27xf32>, vector<27x49xf32>, vector<6x49xf32> -> vector<6x49xf32>
    %28 = vector.broadcast %1 : vector<6x1xf32> to vector<6x49xf32>
    %29 = arith.addf %27, %28 : vector<6x49xf32>
    %cst_22 = arith.constant 0.000000e+00 : f32
    %30 = vector.broadcast %cst_22 : f32 to vector<6x49xf32>
    %31 = arith.maximumf %29, %30 : vector<6x49xf32>
    %32 = arith.maximumf %24, %31 : vector<6x49xf32>
    %c0_23 = arith.constant 0 : index
    %c4 = arith.constant 4 : index
    %c0_24 = arith.constant 0 : index
    %c0_25 = arith.constant 0 : index
    %33 = vector.load %arg1[%c0_23, %c4, %c0_24, %c0_25] : memref<1x9x27x49xf32, #tpu.memory_space<vmem>>, vector<1x1x27x49xf32>
    %34 = vector.shape_cast %33 : vector<1x1x27x49xf32> to vector<27x49xf32>
    %cst_26 = arith.constant dense<0.000000e+00> : vector<6x49xf32>
    %35 = tpu.matmul %0, %34, %cst_26 {dimension_numbers = #tpu.dot_dimension_numbers<[1], [0], [0], [1], [0, 0, 1, 1], [], []>} : vector<6x27xf32>, vector<27x49xf32>, vector<6x49xf32> -> vector<6x49xf32>
    %36 = vector.broadcast %1 : vector<6x1xf32> to vector<6x49xf32>
    %37 = arith.addf %35, %36 : vector<6x49xf32>
    %cst_27 = arith.constant 0.000000e+00 : f32
    %38 = vector.broadcast %cst_27 : f32 to vector<6x49xf32>
    %39 = arith.maximumf %37, %38 : vector<6x49xf32>
    %40 = arith.maximumf %32, %39 : vector<6x49xf32>
    %c0_28 = arith.constant 0 : index
    %c5 = arith.constant 5 : index
    %c0_29 = arith.constant 0 : index
    %c0_30 = arith.constant 0 : index
    %41 = vector.load %arg1[%c0_28, %c5, %c0_29, %c0_30] : memref<1x9x27x49xf32, #tpu.memory_space<vmem>>, vector<1x1x27x49xf32>
    %42 = vector.shape_cast %41 : vector<1x1x27x49xf32> to vector<27x49xf32>
    %cst_31 = arith.constant dense<0.000000e+00> : vector<6x49xf32>
    %43 = tpu.matmul %0, %42, %cst_31 {dimension_numbers = #tpu.dot_dimension_numbers<[1], [0], [0], [1], [0, 0, 1, 1], [], []>} : vector<6x27xf32>, vector<27x49xf32>, vector<6x49xf32> -> vector<6x49xf32>
    %44 = vector.broadcast %1 : vector<6x1xf32> to vector<6x49xf32>
    %45 = arith.addf %43, %44 : vector<6x49xf32>
    %cst_32 = arith.constant 0.000000e+00 : f32
    %46 = vector.broadcast %cst_32 : f32 to vector<6x49xf32>
    %47 = arith.maximumf %45, %46 : vector<6x49xf32>
    %48 = arith.maximumf %40, %47 : vector<6x49xf32>
    %c0_33 = arith.constant 0 : index
    %c6 = arith.constant 6 : index
    %c0_34 = arith.constant 0 : index
    %c0_35 = arith.constant 0 : index
    %49 = vector.load %arg1[%c0_33, %c6, %c0_34, %c0_35] : memref<1x9x27x49xf32, #tpu.memory_space<vmem>>, vector<1x1x27x49xf32>
    %50 = vector.shape_cast %49 : vector<1x1x27x49xf32> to vector<27x49xf32>
    %cst_36 = arith.constant dense<0.000000e+00> : vector<6x49xf32>
    %51 = tpu.matmul %0, %50, %cst_36 {dimension_numbers = #tpu.dot_dimension_numbers<[1], [0], [0], [1], [0, 0, 1, 1], [], []>} : vector<6x27xf32>, vector<27x49xf32>, vector<6x49xf32> -> vector<6x49xf32>
    %52 = vector.broadcast %1 : vector<6x1xf32> to vector<6x49xf32>
    %53 = arith.addf %51, %52 : vector<6x49xf32>
    %cst_37 = arith.constant 0.000000e+00 : f32
    %54 = vector.broadcast %cst_37 : f32 to vector<6x49xf32>
    %55 = arith.maximumf %53, %54 : vector<6x49xf32>
    %56 = arith.maximumf %48, %55 : vector<6x49xf32>
    %c0_38 = arith.constant 0 : index
    %c7 = arith.constant 7 : index
    %c0_39 = arith.constant 0 : index
    %c0_40 = arith.constant 0 : index
    %57 = vector.load %arg1[%c0_38, %c7, %c0_39, %c0_40] : memref<1x9x27x49xf32, #tpu.memory_space<vmem>>, vector<1x1x27x49xf32>
    %58 = vector.shape_cast %57 : vector<1x1x27x49xf32> to vector<27x49xf32>
    %cst_41 = arith.constant dense<0.000000e+00> : vector<6x49xf32>
    %59 = tpu.matmul %0, %58, %cst_41 {dimension_numbers = #tpu.dot_dimension_numbers<[1], [0], [0], [1], [0, 0, 1, 1], [], []>} : vector<6x27xf32>, vector<27x49xf32>, vector<6x49xf32> -> vector<6x49xf32>
    %60 = vector.broadcast %1 : vector<6x1xf32> to vector<6x49xf32>
    %61 = arith.addf %59, %60 : vector<6x49xf32>
    %cst_42 = arith.constant 0.000000e+00 : f32
    %62 = vector.broadcast %cst_42 : f32 to vector<6x49xf32>
    %63 = arith.maximumf %61, %62 : vector<6x49xf32>
    %64 = arith.maximumf %56, %63 : vector<6x49xf32>
    %c0_43 = arith.constant 0 : index
    %c8 = arith.constant 8 : index
    %c0_44 = arith.constant 0 : index
    %c0_45 = arith.constant 0 : index
    %65 = vector.load %arg1[%c0_43, %c8, %c0_44, %c0_45] : memref<1x9x27x49xf32, #tpu.memory_space<vmem>>, vector<1x1x27x49xf32>
    %66 = vector.shape_cast %65 : vector<1x1x27x49xf32> to vector<27x49xf32>
    %cst_46 = arith.constant dense<0.000000e+00> : vector<6x49xf32>
    %67 = tpu.matmul %0, %66, %cst_46 {dimension_numbers = #tpu.dot_dimension_numbers<[1], [0], [0], [1], [0, 0, 1, 1], [], []>} : vector<6x27xf32>, vector<27x49xf32>, vector<6x49xf32> -> vector<6x49xf32>
    %68 = vector.broadcast %1 : vector<6x1xf32> to vector<6x49xf32>
    %69 = arith.addf %67, %68 : vector<6x49xf32>
    %cst_47 = arith.constant 0.000000e+00 : f32
    %70 = vector.broadcast %cst_47 : f32 to vector<6x49xf32>
    %71 = arith.maximumf %69, %70 : vector<6x49xf32>
    %72 = arith.maximumf %64, %71 : vector<6x49xf32>
    %c0_48 = arith.constant 0 : index
    %c0_49 = arith.constant 0 : index
    %c0_50 = arith.constant 0 : index
    %73 = vector.load %arg5[%c0_48, %c0_49, %c0_50] : memref<9x49x9xf32, #tpu.memory_space<vmem>>, vector<1x49x9xf32>
    %74 = vector.shape_cast %73 : vector<1x49x9xf32> to vector<49x9xf32>
    %cst_51 = arith.constant dense<0.000000e+00> : vector<6x9xf32>
    %75 = tpu.matmul %72, %74, %cst_51 {dimension_numbers = #tpu.dot_dimension_numbers<[1], [0], [0], [1], [0, 0, 1, 1], [], []>} : vector<6x49xf32>, vector<49x9xf32>, vector<6x9xf32> -> vector<6x9xf32>
    %c0_52 = arith.constant 0 : index
    %c0_53 = arith.constant 0 : index
    %c0_54 = arith.constant 0 : index
    %76 = vector.load %arg6[%c0_52, %c0_53, %c0_54] : memref<9x12x6xf32, #tpu.memory_space<vmem>>, vector<1x12x6xf32>
    %77 = vector.shape_cast %76 : vector<1x12x6xf32> to vector<12x6xf32>
    %cst_55 = arith.constant dense<0.000000e+00> : vector<12x9xf32>
    %78 = tpu.matmul %77, %75, %cst_55 {dimension_numbers = #tpu.dot_dimension_numbers<[1], [0], [0], [1], [0, 0, 1, 1], [], []>} : vector<12x6xf32>, vector<6x9xf32>, vector<12x9xf32> -> vector<12x9xf32>
    %c1_56 = arith.constant 1 : index
    %c0_57 = arith.constant 0 : index
    %c0_58 = arith.constant 0 : index
    %79 = vector.load %arg5[%c1_56, %c0_57, %c0_58] : memref<9x49x9xf32, #tpu.memory_space<vmem>>, vector<1x49x9xf32>
    %80 = vector.shape_cast %79 : vector<1x49x9xf32> to vector<49x9xf32>
    %cst_59 = arith.constant dense<0.000000e+00> : vector<6x9xf32>
    %81 = tpu.matmul %72, %80, %cst_59 {dimension_numbers = #tpu.dot_dimension_numbers<[1], [0], [0], [1], [0, 0, 1, 1], [], []>} : vector<6x49xf32>, vector<49x9xf32>, vector<6x9xf32> -> vector<6x9xf32>
    %c1_60 = arith.constant 1 : index
    %c0_61 = arith.constant 0 : index
    %c0_62 = arith.constant 0 : index
    %82 = vector.load %arg6[%c1_60, %c0_61, %c0_62] : memref<9x12x6xf32, #tpu.memory_space<vmem>>, vector<1x12x6xf32>
    %83 = vector.shape_cast %82 : vector<1x12x6xf32> to vector<12x6xf32>
    %cst_63 = arith.constant dense<0.000000e+00> : vector<12x9xf32>
    %84 = tpu.matmul %83, %81, %cst_63 {dimension_numbers = #tpu.dot_dimension_numbers<[1], [0], [0], [1], [0, 0, 1, 1], [], []>} : vector<12x6xf32>, vector<6x9xf32>, vector<12x9xf32> -> vector<12x9xf32>
    %85 = arith.addf %78, %84 : vector<12x9xf32>
    %c2_64 = arith.constant 2 : index
    %c0_65 = arith.constant 0 : index
    %c0_66 = arith.constant 0 : index
    %86 = vector.load %arg5[%c2_64, %c0_65, %c0_66] : memref<9x49x9xf32, #tpu.memory_space<vmem>>, vector<1x49x9xf32>
    %87 = vector.shape_cast %86 : vector<1x49x9xf32> to vector<49x9xf32>
    %cst_67 = arith.constant dense<0.000000e+00> : vector<6x9xf32>
    %88 = tpu.matmul %72, %87, %cst_67 {dimension_numbers = #tpu.dot_dimension_numbers<[1], [0], [0], [1], [0, 0, 1, 1], [], []>} : vector<6x49xf32>, vector<49x9xf32>, vector<6x9xf32> -> vector<6x9xf32>
    %c2_68 = arith.constant 2 : index
    %c0_69 = arith.constant 0 : index
    %c0_70 = arith.constant 0 : index
    %89 = vector.load %arg6[%c2_68, %c0_69, %c0_70] : memref<9x12x6xf32, #tpu.memory_space<vmem>>, vector<1x12x6xf32>
    %90 = vector.shape_cast %89 : vector<1x12x6xf32> to vector<12x6xf32>
    %cst_71 = arith.constant dense<0.000000e+00> : vector<12x9xf32>
    %91 = tpu.matmul %90, %88, %cst_71 {dimension_numbers = #tpu.dot_dimension_numbers<[1], [0], [0], [1], [0, 0, 1, 1], [], []>} : vector<12x6xf32>, vector<6x9xf32>, vector<12x9xf32> -> vector<12x9xf32>
    %92 = arith.addf %85, %91 : vector<12x9xf32>
    %c3_72 = arith.constant 3 : index
    %c0_73 = arith.constant 0 : index
    %c0_74 = arith.constant 0 : index
    %93 = vector.load %arg5[%c3_72, %c0_73, %c0_74] : memref<9x49x9xf32, #tpu.memory_space<vmem>>, vector<1x49x9xf32>
    %94 = vector.shape_cast %93 : vector<1x49x9xf32> to vector<49x9xf32>
    %cst_75 = arith.constant dense<0.000000e+00> : vector<6x9xf32>
    %95 = tpu.matmul %72, %94, %cst_75 {dimension_numbers = #tpu.dot_dimension_numbers<[1], [0], [0], [1], [0, 0, 1, 1], [], []>} : vector<6x49xf32>, vector<49x9xf32>, vector<6x9xf32> -> vector<6x9xf32>
    %c3_76 = arith.constant 3 : index
    %c0_77 = arith.constant 0 : index
    %c0_78 = arith.constant 0 : index
    %96 = vector.load %arg6[%c3_76, %c0_77, %c0_78] : memref<9x12x6xf32, #tpu.memory_space<vmem>>, vector<1x12x6xf32>
    %97 = vector.shape_cast %96 : vector<1x12x6xf32> to vector<12x6xf32>
    %cst_79 = arith.constant dense<0.000000e+00> : vector<12x9xf32>
    %98 = tpu.matmul %97, %95, %cst_79 {dimension_numbers = #tpu.dot_dimension_numbers<[1], [0], [0], [1], [0, 0, 1, 1], [], []>} : vector<12x6xf32>, vector<6x9xf32>, vector<12x9xf32> -> vector<12x9xf32>
    %99 = arith.addf %92, %98 : vector<12x9xf32>
    %c4_80 = arith.constant 4 : index
    %c0_81 = arith.constant 0 : index
    %c0_82 = arith.constant 0 : index
    %100 = vector.load %arg5[%c4_80, %c0_81, %c0_82] : memref<9x49x9xf32, #tpu.memory_space<vmem>>, vector<1x49x9xf32>
    %101 = vector.shape_cast %100 : vector<1x49x9xf32> to vector<49x9xf32>
    %cst_83 = arith.constant dense<0.000000e+00> : vector<6x9xf32>
    %102 = tpu.matmul %72, %101, %cst_83 {dimension_numbers = #tpu.dot_dimension_numbers<[1], [0], [0], [1], [0, 0, 1, 1], [], []>} : vector<6x49xf32>, vector<49x9xf32>, vector<6x9xf32> -> vector<6x9xf32>
    %c4_84 = arith.constant 4 : index
    %c0_85 = arith.constant 0 : index
    %c0_86 = arith.constant 0 : index
    %103 = vector.load %arg6[%c4_84, %c0_85, %c0_86] : memref<9x12x6xf32, #tpu.memory_space<vmem>>, vector<1x12x6xf32>
    %104 = vector.shape_cast %103 : vector<1x12x6xf32> to vector<12x6xf32>
    %cst_87 = arith.constant dense<0.000000e+00> : vector<12x9xf32>
    %105 = tpu.matmul %104, %102, %cst_87 {dimension_numbers = #tpu.dot_dimension_numbers<[1], [0], [0], [1], [0, 0, 1, 1], [], []>} : vector<12x6xf32>, vector<6x9xf32>, vector<12x9xf32> -> vector<12x9xf32>
    %106 = arith.addf %99, %105 : vector<12x9xf32>
    %c5_88 = arith.constant 5 : index
    %c0_89 = arith.constant 0 : index
    %c0_90 = arith.constant 0 : index
    %107 = vector.load %arg5[%c5_88, %c0_89, %c0_90] : memref<9x49x9xf32, #tpu.memory_space<vmem>>, vector<1x49x9xf32>
    %108 = vector.shape_cast %107 : vector<1x49x9xf32> to vector<49x9xf32>
    %cst_91 = arith.constant dense<0.000000e+00> : vector<6x9xf32>
    %109 = tpu.matmul %72, %108, %cst_91 {dimension_numbers = #tpu.dot_dimension_numbers<[1], [0], [0], [1], [0, 0, 1, 1], [], []>} : vector<6x49xf32>, vector<49x9xf32>, vector<6x9xf32> -> vector<6x9xf32>
    %c5_92 = arith.constant 5 : index
    %c0_93 = arith.constant 0 : index
    %c0_94 = arith.constant 0 : index
    %110 = vector.load %arg6[%c5_92, %c0_93, %c0_94] : memref<9x12x6xf32, #tpu.memory_space<vmem>>, vector<1x12x6xf32>
    %111 = vector.shape_cast %110 : vector<1x12x6xf32> to vector<12x6xf32>
    %cst_95 = arith.constant dense<0.000000e+00> : vector<12x9xf32>
    %112 = tpu.matmul %111, %109, %cst_95 {dimension_numbers = #tpu.dot_dimension_numbers<[1], [0], [0], [1], [0, 0, 1, 1], [], []>} : vector<12x6xf32>, vector<6x9xf32>, vector<12x9xf32> -> vector<12x9xf32>
    %113 = arith.addf %106, %112 : vector<12x9xf32>
    %c6_96 = arith.constant 6 : index
    %c0_97 = arith.constant 0 : index
    %c0_98 = arith.constant 0 : index
    %114 = vector.load %arg5[%c6_96, %c0_97, %c0_98] : memref<9x49x9xf32, #tpu.memory_space<vmem>>, vector<1x49x9xf32>
    %115 = vector.shape_cast %114 : vector<1x49x9xf32> to vector<49x9xf32>
    %cst_99 = arith.constant dense<0.000000e+00> : vector<6x9xf32>
    %116 = tpu.matmul %72, %115, %cst_99 {dimension_numbers = #tpu.dot_dimension_numbers<[1], [0], [0], [1], [0, 0, 1, 1], [], []>} : vector<6x49xf32>, vector<49x9xf32>, vector<6x9xf32> -> vector<6x9xf32>
    %c6_100 = arith.constant 6 : index
    %c0_101 = arith.constant 0 : index
    %c0_102 = arith.constant 0 : index
    %117 = vector.load %arg6[%c6_100, %c0_101, %c0_102] : memref<9x12x6xf32, #tpu.memory_space<vmem>>, vector<1x12x6xf32>
    %118 = vector.shape_cast %117 : vector<1x12x6xf32> to vector<12x6xf32>
    %cst_103 = arith.constant dense<0.000000e+00> : vector<12x9xf32>
    %119 = tpu.matmul %118, %116, %cst_103 {dimension_numbers = #tpu.dot_dimension_numbers<[1], [0], [0], [1], [0, 0, 1, 1], [], []>} : vector<12x6xf32>, vector<6x9xf32>, vector<12x9xf32> -> vector<12x9xf32>
    %120 = arith.addf %113, %119 : vector<12x9xf32>
    %c7_104 = arith.constant 7 : index
    %c0_105 = arith.constant 0 : index
    %c0_106 = arith.constant 0 : index
    %121 = vector.load %arg5[%c7_104, %c0_105, %c0_106] : memref<9x49x9xf32, #tpu.memory_space<vmem>>, vector<1x49x9xf32>
    %122 = vector.shape_cast %121 : vector<1x49x9xf32> to vector<49x9xf32>
    %cst_107 = arith.constant dense<0.000000e+00> : vector<6x9xf32>
    %123 = tpu.matmul %72, %122, %cst_107 {dimension_numbers = #tpu.dot_dimension_numbers<[1], [0], [0], [1], [0, 0, 1, 1], [], []>} : vector<6x49xf32>, vector<49x9xf32>, vector<6x9xf32> -> vector<6x9xf32>
    %c7_108 = arith.constant 7 : index
    %c0_109 = arith.constant 0 : index
    %c0_110 = arith.constant 0 : index
    %124 = vector.load %arg6[%c7_108, %c0_109, %c0_110] : memref<9x12x6xf32, #tpu.memory_space<vmem>>, vector<1x12x6xf32>
    %125 = vector.shape_cast %124 : vector<1x12x6xf32> to vector<12x6xf32>
    %cst_111 = arith.constant dense<0.000000e+00> : vector<12x9xf32>
    %126 = tpu.matmul %125, %123, %cst_111 {dimension_numbers = #tpu.dot_dimension_numbers<[1], [0], [0], [1], [0, 0, 1, 1], [], []>} : vector<12x6xf32>, vector<6x9xf32>, vector<12x9xf32> -> vector<12x9xf32>
    %127 = arith.addf %120, %126 : vector<12x9xf32>
    %c8_112 = arith.constant 8 : index
    %c0_113 = arith.constant 0 : index
    %c0_114 = arith.constant 0 : index
    %128 = vector.load %arg5[%c8_112, %c0_113, %c0_114] : memref<9x49x9xf32, #tpu.memory_space<vmem>>, vector<1x49x9xf32>
    %129 = vector.shape_cast %128 : vector<1x49x9xf32> to vector<49x9xf32>
    %cst_115 = arith.constant dense<0.000000e+00> : vector<6x9xf32>
    %130 = tpu.matmul %72, %129, %cst_115 {dimension_numbers = #tpu.dot_dimension_numbers<[1], [0], [0], [1], [0, 0, 1, 1], [], []>} : vector<6x49xf32>, vector<49x9xf32>, vector<6x9xf32> -> vector<6x9xf32>
    %c8_116 = arith.constant 8 : index
    %c0_117 = arith.constant 0 : index
    %c0_118 = arith.constant 0 : index
    %131 = vector.load %arg6[%c8_116, %c0_117, %c0_118] : memref<9x12x6xf32, #tpu.memory_space<vmem>>, vector<1x12x6xf32>
    %132 = vector.shape_cast %131 : vector<1x12x6xf32> to vector<12x6xf32>
    %cst_119 = arith.constant dense<0.000000e+00> : vector<12x9xf32>
    %133 = tpu.matmul %132, %130, %cst_119 {dimension_numbers = #tpu.dot_dimension_numbers<[1], [0], [0], [1], [0, 0, 1, 1], [], []>} : vector<12x6xf32>, vector<6x9xf32>, vector<12x9xf32> -> vector<12x9xf32>
    %134 = arith.addf %127, %133 : vector<12x9xf32>
    %c0_120 = arith.constant 0 : index
    %c0_121 = arith.constant 0 : index
    %135 = vector.load %arg7[%c0_120, %c0_121] : memref<12x1xf32, #tpu.memory_space<vmem>>, vector<12x1xf32>
    %136 = vector.broadcast %135 : vector<12x1xf32> to vector<12x9xf32>
    %137 = arith.addf %134, %136 : vector<12x9xf32>
    %cst_122 = arith.constant 0.000000e+00 : f32
    %138 = vector.broadcast %cst_122 : f32 to vector<12x9xf32>
    %139 = arith.maximumf %137, %138 : vector<12x9xf32>
    %cst_123 = arith.constant dense<0xFF800000> : vector<12xf32>
    %140 = vector.multi_reduction <maximumf>, %139, %cst_123 [1] : vector<12x9xf32> to vector<12xf32>
    %141 = vector.shape_cast %140 : vector<12xf32> to vector<12x1xf32>
    %c0_124 = arith.constant 0 : index
    %c0_125 = arith.constant 0 : index
    %c0_126 = arith.constant 0 : index
    %142 = vector.load %arg2[%c0_124, %c0_125, %c0_126] : memref<1x32x1xf32, #tpu.memory_space<vmem>>, vector<1x32x1xf32>
    %143 = vector.shape_cast %142 : vector<1x32x1xf32> to vector<32x1xf32>
    %c0_127 = arith.constant 0 : index
    %c0_128 = arith.constant 0 : index
    %144 = vector.load %arg12[%c0_127, %c0_128] : memref<1x32xf32, #tpu.memory_space<vmem>>, vector<1x32xf32>
    %cst_129 = arith.constant dense<0.000000e+00> : vector<1x1xf32>
    %145 = tpu.matmul %144, %143, %cst_129 {dimension_numbers = #tpu.dot_dimension_numbers<[1], [0], [0], [1], [0, 0, 1, 1], [], []>} : vector<1x32xf32>, vector<32x1xf32>, vector<1x1xf32> -> vector<1x1xf32>
    %c0_130 = arith.constant 0 : index
    %c0_131 = arith.constant 0 : index
    %146 = vector.load %arg13[%c0_130, %c0_131] : memref<1x12xf32, #tpu.memory_space<vmem>>, vector<1x12xf32>
    %cst_132 = arith.constant dense<0.000000e+00> : vector<1x1xf32>
    %147 = tpu.matmul %146, %141, %cst_132 {dimension_numbers = #tpu.dot_dimension_numbers<[1], [0], [0], [1], [0, 0, 1, 1], [], []>} : vector<1x12xf32>, vector<12x1xf32>, vector<1x1xf32> -> vector<1x1xf32>
    %148 = arith.addf %145, %147 : vector<1x1xf32>
    %c0_133 = arith.constant 0 : index
    %c0_134 = arith.constant 0 : index
    %149 = vector.load %arg14[%c0_133, %c0_134] : memref<1x1xf32, #tpu.memory_space<vmem>>, vector<1x1xf32>
    %150 = arith.addf %148, %149 : vector<1x1xf32>
    %c0_135 = arith.constant 0 : index
    %c0_136 = arith.constant 0 : index
    %151 = vector.load %arg8[%c0_135, %c0_136] : memref<12x32xf32, #tpu.memory_space<vmem>>, vector<12x32xf32>
    %cst_137 = arith.constant dense<0.000000e+00> : vector<12x1xf32>
    %152 = tpu.matmul %151, %143, %cst_137 {dimension_numbers = #tpu.dot_dimension_numbers<[1], [0], [0], [1], [0, 0, 1, 1], [], []>} : vector<12x32xf32>, vector<32x1xf32>, vector<12x1xf32> -> vector<12x1xf32>
    %c0_138 = arith.constant 0 : index
    %c0_139 = arith.constant 0 : index
    %153 = vector.load %arg9[%c0_138, %c0_139] : memref<12x12xf32, #tpu.memory_space<vmem>>, vector<12x12xf32>
    %cst_140 = arith.constant dense<0.000000e+00> : vector<12x1xf32>
    %154 = tpu.matmul %153, %141, %cst_140 {dimension_numbers = #tpu.dot_dimension_numbers<[1], [0], [0], [1], [0, 0, 1, 1], [], []>} : vector<12x12xf32>, vector<12x1xf32>, vector<12x1xf32> -> vector<12x1xf32>
    %155 = arith.addf %152, %154 : vector<12x1xf32>
    %c0_141 = arith.constant 0 : index
    %c0_142 = arith.constant 0 : index
    %156 = vector.load %arg10[%c0_141, %c0_142] : memref<12x32xf32, #tpu.memory_space<vmem>>, vector<12x32xf32>
    %157 = arith.mulf %143, %143 : vector<32x1xf32>
    %cst_143 = arith.constant dense<0.000000e+00> : vector<12x1xf32>
    %158 = tpu.matmul %156, %157, %cst_143 {dimension_numbers = #tpu.dot_dimension_numbers<[1], [0], [0], [1], [0, 0, 1, 1], [], []>} : vector<12x32xf32>, vector<32x1xf32>, vector<12x1xf32> -> vector<12x1xf32>
    %c0_144 = arith.constant 0 : index
    %c0_145 = arith.constant 0 : index
    %159 = vector.load %arg11[%c0_144, %c0_145] : memref<12x12xf32, #tpu.memory_space<vmem>>, vector<12x12xf32>
    %160 = arith.mulf %141, %141 : vector<12x1xf32>
    %cst_146 = arith.constant dense<0.000000e+00> : vector<12x1xf32>
    %161 = tpu.matmul %159, %160, %cst_146 {dimension_numbers = #tpu.dot_dimension_numbers<[1], [0], [0], [1], [0, 0, 1, 1], [], []>} : vector<12x12xf32>, vector<12x1xf32>, vector<12x1xf32> -> vector<12x1xf32>
    %162 = arith.addf %158, %161 : vector<12x1xf32>
    %163 = arith.mulf %155, %155 : vector<12x1xf32>
    %164 = arith.addf %163, %162 : vector<12x1xf32>
    %cst_147 = arith.constant dense<0.000000e+00> : vector<1xf32>
    %165 = vector.multi_reduction <add>, %164, %cst_147 [0] : vector<12x1xf32> to vector<1xf32>
    %166 = vector.shape_cast %165 : vector<1xf32> to vector<1x1xf32>
    %cst_148 = arith.constant 5.000000e-01 : f32
    %167 = vector.broadcast %cst_148 : f32 to vector<1x1xf32>
    %168 = arith.mulf %167, %166 : vector<1x1xf32>
    %169 = arith.addf %150, %168 : vector<1x1xf32>
    %c0_149 = arith.constant 0 : index
    %c0_150 = arith.constant 0 : index
    %c0_151 = arith.constant 0 : index
    %170 = vector.load %arg15[%c0_149, %c0_150, %c0_151] : memref<1x1x1xf32, #tpu.memory_space<vmem>>, vector<1x1x1xf32>
    %171 = vector.shape_cast %170 : vector<1x1x1xf32> to vector<1x1xf32>
    %172 = vector.shape_cast %169 : vector<1x1xf32> to vector<1x1x1xf32>
    tpu.vector_store %arg15[%c0_149, %c0_150, %c0_151], %172 {strides = array<i32>} : memref<1x1x1xf32, #tpu.memory_space<vmem>>, vector<1x1x1xf32>,
    return
  }
  func.func @transform_0(%arg0: i32) -> (i32, i32, i32, i32) {
    %c0_i32 = arith.constant 0 : i32
    %c0_i32_0 = arith.constant 0 : i32
    %c0_i32_1 = arith.constant 0 : i32
    %c0_i32_2 = arith.constant 0 : i32
    return %arg0, %c0_i32, %c0_i32_0, %c0_i32_1 : i32, i32, i32, i32
  }
  func.func @transform_1(%arg0: i32) -> (i32, i32, i32) {
    %c0_i32 = arith.constant 0 : i32
    %c0_i32_0 = arith.constant 0 : i32
    %c0_i32_1 = arith.constant 0 : i32
    return %arg0, %c0_i32, %c0_i32_0 : i32, i32, i32
  }
  func.func @transform_2(%arg0: i32) -> (i32, i32) {
    %c0_i32 = arith.constant 0 : i32
    %c0_i32_0 = arith.constant 0 : i32
    %c0_i32_1 = arith.constant 0 : i32
    return %c0_i32, %c0_i32_0 : i32, i32
  }
  func.func @transform_3(%arg0: i32) -> (i32, i32) {
    %c0_i32 = arith.constant 0 : i32
    %c0_i32_0 = arith.constant 0 : i32
    %c0_i32_1 = arith.constant 0 : i32
    return %c0_i32, %c0_i32_0 : i32, i32
  }
  func.func @transform_4(%arg0: i32) -> (i32, i32, i32) {
    %c0_i32 = arith.constant 0 : i32
    %c0_i32_0 = arith.constant 0 : i32
    %c0_i32_1 = arith.constant 0 : i32
    %c0_i32_2 = arith.constant 0 : i32
    return %c0_i32, %c0_i32_0, %c0_i32_1 : i32, i32, i32
  }
  func.func @transform_5(%arg0: i32) -> (i32, i32, i32) {
    %c0_i32 = arith.constant 0 : i32
    %c0_i32_0 = arith.constant 0 : i32
    %c0_i32_1 = arith.constant 0 : i32
    %c0_i32_2 = arith.constant 0 : i32
    return %c0_i32, %c0_i32_0, %c0_i32_1 : i32, i32, i32
  }
  func.func @transform_6(%arg0: i32) -> (i32, i32) {
    %c0_i32 = arith.constant 0 : i32
    %c0_i32_0 = arith.constant 0 : i32
    %c0_i32_1 = arith.constant 0 : i32
    return %c0_i32, %c0_i32_0 : i32, i32
  }
  func.func @transform_7(%arg0: i32) -> (i32, i32) {
    %c0_i32 = arith.constant 0 : i32
    %c0_i32_0 = arith.constant 0 : i32
    %c0_i32_1 = arith.constant 0 : i32
    return %c0_i32, %c0_i32_0 : i32, i32
  }
  func.func @transform_8(%arg0: i32) -> (i32, i32) {
    %c0_i32 = arith.constant 0 : i32
    %c0_i32_0 = arith.constant 0 : i32
    %c0_i32_1 = arith.constant 0 : i32
    return %c0_i32, %c0_i32_0 : i32, i32
  }
  func.func @transform_9(%arg0: i32) -> (i32, i32) {
    %c0_i32 = arith.constant 0 : i32
    %c0_i32_0 = arith.constant 0 : i32
    %c0_i32_1 = arith.constant 0 : i32
    return %c0_i32, %c0_i32_0 : i32, i32
  }
  func.func @transform_10(%arg0: i32) -> (i32, i32) {
    %c0_i32 = arith.constant 0 : i32
    %c0_i32_0 = arith.constant 0 : i32
    %c0_i32_1 = arith.constant 0 : i32
    return %c0_i32, %c0_i32_0 : i32, i32
  }
  func.func @transform_11(%arg0: i32) -> (i32, i32) {
    %c0_i32 = arith.constant 0 : i32
    %c0_i32_0 = arith.constant 0 : i32
    %c0_i32_1 = arith.constant 0 : i32
    return %c0_i32, %c0_i32_0 : i32, i32
  }
  func.func @transform_12(%arg0: i32) -> (i32, i32) {
    %c0_i32 = arith.constant 0 : i32
    %c0_i32_0 = arith.constant 0 : i32
    %c0_i32_1 = arith.constant 0 : i32
    return %c0_i32, %c0_i32_0 : i32, i32
  }
  func.func @transform_13(%arg0: i32) -> (i32, i32) {
    %c0_i32 = arith.constant 0 : i32
    %c0_i32_0 = arith.constant 0 : i32
    %c0_i32_1 = arith.constant 0 : i32
    return %c0_i32, %c0_i32_0 : i32, i32
  }
  func.func @transform_14(%arg0: i32) -> (i32, i32, i32) {
    %c0_i32 = arith.constant 0 : i32
    %c0_i32_0 = arith.constant 0 : i32
    %c0_i32_1 = arith.constant 0 : i32
    return %arg0, %c0_i32, %c0_i32_0 : i32, i32, i32
  }
}

</mosaic_0001>

<bundles_post_ra>
// kernel: mul.1
= control target key start
LH: loop header
LB: loop body
LE: loop exit
PB: predicated region body
PF: predicated region fallthrough
CT: control target
= control target key end

     0   :  { %s56_s0 = inlined_call_operand.vmem [shape: f32[44,12], index: 0, kind: input, shape index: {}, may-alias: {0,1}]   ;;  %s57_s1 = inlined_call_operand.vmem [shape: f32[44,12], index: 1, kind: input, shape index: {}, may-alias: {0,1}]   ;;  %s58_s2 = inlined_call_operand.vmem [shape: f32[44,12], index: 2, kind: output, shape index: {}]  }
   0x1   :  { %v3_v0 = vld [vmem:[%s56_s0] sm:$0xff]  ;;  %v20_v2 = vld [vmem:[%s56_s0 + $0x8] sm:$0xff] }
   0x2   :  { %v4_v1 = vld [vmem:[%s57_s1] sm:$0xff]  ;;  %v21_v4 = vld [vmem:[%s57_s1 + $0x8] sm:$0xff] }
   0x3   :  { %v7_v3 = vmul.f32 %v4_v1, %v3_v0  ;;  %v16_v5 = vmul.f32 %v21_v4, %v20_v2 }
   0x5   :  { %9 = vst [vmem:[%s58_s2] sm:$0xff] %v7_v3 }
   0x6   :  { %22 = vst [vmem:[%s58_s2 + $0x8] sm:$0xff] %v16_v5 }

// kernel: cnn_fm_forward.1
= control target key start
LH: loop header
LB: loop body
LE: loop exit
PB: predicated region body
PF: predicated region fallthrough
CT: control target
= control target key end

     0   :  { %s1964_s15 = smov 0   ;;  %s2396_s0 = inlined_call_operand.vmem [shape: f32[2,9,27,49], index: 0, kind: input, shape index: {}]   ;;  %s2397_s1 = inlined_call_operand.vmem [shape: f32[2,32,1], index: 1, kind: input, shape index: {}]   ;;  %s2398_s2 = inlined_call_operand.vmem [shape: f32[6,27], index: 2, kind: input, shape index: {}]   ;;  %s2399_s3 = inlined_call_operand.vmem [shape: f32[6,1], index: 3, kind: input, shape index: {}]   ;;  %s2400_s4 = inlined_call_operand.vmem [shape: f32[9,49,9], index: 4, kind: input, shape index: {}]   ;;  %s2401_s5 = inlined_call_operand.vmem [shape: f32[9,12,6], index: 5, kind: input, shape index: {}]   ;;  %s2402_s6 = inlined_call_operand.vmem [shape: f32[12,1], index: 6, kind: input, shape index: {}]   ;;  %s2403_s7 = inlined_call_operand.vmem [shape: f32[12,32], index: 7, kind: input, shape index: {}]   ;;  %s2404_s8 = inlined_call_operand.vmem [shape: f32[12,12], index: 8, kind: input, shape index: {}]   ;;  %s2405_s9 = inlined_call_operand.vmem [shape: f32[12,32], index: 9, kind: input, shape index: {}]   ;;  %s2406_s10 = inlined_call_operand.vmem [shape: f32[12,12], index: 10, kind: input, shape index: {}]   ;;  %s2407_s11 = inlined_call_operand.vmem [shape: f32[1,32], index: 11, kind: input, shape index: {}]   ;;  %s2408_s12 = inlined_call_operand.vmem [shape: f32[1,12], index: 12, kind: input, shape index: {}]   ;;  %s2409_s13 = inlined_call_operand.<no memory space> [shape: f32[1,1], index: 13, kind: input, shape index: {}]   ;;  %s2410_s14 = inlined_call_operand.vmem [shape: f32[2,1,1], index: 14, kind: output, shape index: {}]  }
   0x1   :  { %v19_v0 = vstv %s2409_s13 }
   0x2   :  { %20 = vst [vmem:[#allocation2] sm:$0x1] %v19_v0 }
   0x3 LB: > { %s1674_s16 = sadd.s32 4294967295, %s1883_s15   ;;  %p1678_p0 = scmp.ge.s32.totalorder %s1883_s15, 1  ;;  %s1883_s15 = sphi %s1964_s15, %s26_s15  }
   0x4   : > { %p424_p1 = scmp.lt.s32.totalorder %s1883_s15, 3 }
   0x6   : > { %p425_p2 = pnand %p1678_p0, %p424_p1 }
   0x7   : > { %p473_p3 = scmp.lt.s32.totalorder (!%p425_p2), %s1674_s16, 1 }
   0x8   : > { %428 = sbr.rel (%p425_p2) target bundleno = 1069 (0x42d), region = 76 }
   0xd   : > { %v1885_v1 = vmov 0   ;;  %v487_v2 = vld [vmem:[%s2399_s3] sm:$0x3f]  ;;  %s2412_s16 = smov (!%p473_p3, %s1674_s16), 1  ;;  %vm501_vm0 = vcmask 1042432   ;;  %vm497_vm1 = vcmask 220160  }
   0xe   : > { %1875 = vset.pattern.permute.xlu0 %v1885_v1  ;;  %1876 = vset.pattern.permute.xlu1 %v1885_v1  ;;  %s1865_s18 = smul.u32 288, %s2412_s16  ;;  %v486_v19 = vld [vmem:[%s2398_s2] sm:$0x3f]  ;;  %v1380_v37 = vld [vmem:[%s2402_s6 + $0x8] sm:$0xf]  ;;  %vm777_vm2 = vcmask 1040384  }
   0xf   : > { %494 = vperm.xlu0 %1875, %v487_v2   ;;  %v1740_v41 = vld [vmem:[%s2400_s4 + $0x68] sm:$0x1]  ;;  %v1739_v42 = vld [vmem:[%s2400_s4 + $0x60] sm:$0xff]  ;;  %v1738_v43 = vld [vmem:[%s2400_s4 + $0x58] sm:$0xff]  ;;  %vm773_vm3 = vcmask 400384   ;;  %vm844_vm4 = vcmask 1045504  }
  0x10   : > { %s1981_s21 = scalar_lea.vmem %s2396_s0, %s1865_s18  ;;  %v1737_v44 = vld [vmem:[%s2400_s4 + $0x50] sm:$0xff]  ;;  %v1736_v45 = vld [vmem:[%s2400_s4 + $0x48] sm:$0xff]  ;;  %v1735_v46 = vld [vmem:[%s2400_s4 + $0x40] sm:$0xff]  ;;  %vm837_vm5 = vcmask 48128   ;;  %vm1395_vm6 = vcmask 72704   ;;  %vm1399_vm7 = vcmask 68608  }
  0x11   : > { %v491_v3 = vld [vmem:[%s1981_s21 + $0x18] sm:$0x7]  ;;  %v490_v7 = vld [vmem:[%s1981_s21 + $0x10] sm:$0xff]  ;;  %v489_v11 = vld [vmem:[%s1981_s21 + $0x8] sm:$0xff]  ;;  %s1864_s25 = sshll.u32 %s2412_s16, 5  ;;  %vm1437_vm8 = vcmask 261120  }
  0x12   : > { %v1687_v4 = vld [vmem:[%s1981_s21 + $0x38] sm:$0x7]  ;;  %1682 = vmatpush.msk.msra.mxu0 %vm501_vm0, %v491_v3  ;;  %v1686_v8 = vld [vmem:[%s1981_s21 + $0x30] sm:$0xff]  ;;  %v1685_v12 = vld [vmem:[%s1981_s21 + $0x28] sm:$0xff]  ;;  %s482_s28 = scalar_lea.vmem %s2397_s1, %s1864_s25  ;;  %vm1413_vm9 = vcmask 1043456   ;;  %vm1409_vm10 = vcmask 97280  }
  0x13   : > { %v1693_v5 = vld [vmem:[%s1981_s21 + $0x58] sm:$0x7]  ;;  %1688 = vmatpush.msk.msra.mxu1 %vm501_vm0, %v1687_v4  ;;  %v1692_v9 = vld [vmem:[%s1981_s21 + $0x50] sm:$0xff]  ;;  %v1691_v13 = vld [vmem:[%s1981_s21 + $0x48] sm:$0xff]  ;;  %vm1600_vm11 = vcmask 7168   ;;  %vm1602_vm12 = vcmask 3072  }
  0x14   : > { %v1699_v6 = vld [vmem:[%s1981_s21 + $0x78] sm:$0x7]  ;;  %1694 = vmatpush.msk.msra.mxu2 %vm501_vm0, %v1693_v5  ;;  %v1698_v10 = vld [vmem:[%s1981_s21 + $0x70] sm:$0xff]  ;;  %518 = vmatpush.msra.mxu0 %v490_v7  ;;  %v1697_v14 = vld [vmem:[%s1981_s21 + $0x68] sm:$0xff]  ;;  %vm1613_vm13 = vcmask 0  }
  0x15   : > { %1700 = vmatpush.msk.msra.mxu3 %vm501_vm0, %v1699_v6  ;;  %547 = vmatpush.msra.mxu1 %v1686_v8  ;;  %v488_v15 = vld [vmem:[%s1981_s21] sm:$0xff]  ;;  %v1705_v20 = vld [vmem:[%s1981_s21 + $0x98] sm:$0x7]  ;;  %v1704_v24 = vld [vmem:[%s1981_s21 + $0x90] sm:$0xff] }
  0x16   : > { %577 = vmatpush.msra.mxu2 %v1692_v9  ;;  %v1684_v16 = vld [vmem:[%s1981_s21 + $0x20] sm:$0xff]  ;;  %519 = vmatpush.msra.mxu0 %v489_v11  ;;  %v1711_v21 = vld [vmem:[%s1981_s21 + $0xb8] sm:$0x7]  ;;  %v1710_v25 = vld [vmem:[%s1981_s21 + $0xb0] sm:$0xff] }
  0x17   : > { %607 = vmatpush.msra.mxu3 %v1698_v10  ;;  %548 = vmatpush.msra.mxu1 %v1685_v12  ;;  %v1690_v17 = vld [vmem:[%s1981_s21 + $0x40] sm:$0xff]  ;;  %v1717_v22 = vld [vmem:[%s1981_s21 + $0xd8] sm:$0x7]  ;;  %v1716_v26 = vld [vmem:[%s1981_s21 + $0xd0] sm:$0xff] }
  0x18   : > { %v1696_v18 = vld [vmem:[%s1981_s21 + $0x60] sm:$0xff]  ;;  %578 = vmatpush.msra.mxu2 %v1691_v13  ;;  %520 = vmatpush.msra.mxu0 %v488_v15  ;;  %v1723_v23 = vld [vmem:[%s1981_s21 + $0xf8] sm:$0x7]  ;;  %v1722_v27 = vld [vmem:[%s1981_s21 + $0xf0] sm:$0xff] }
  0x19   : > { %608 = vmatpush.msra.mxu3 %v1697_v14  ;;  %549 = vmatpush.msra.mxu1 %v1684_v16  ;;  %v1703_v28 = vld [vmem:[%s1981_s21 + $0x88] sm:$0xff]  ;;  %v1702_v32 = vld [vmem:[%s1981_s21 + $0x80] sm:$0xff]  ;;  %v1729_v36 = vld [vmem:[%s1981_s21 + $0x118] sm:$0x7] }
  0x1a   : > { %579 = vmatpush.msra.mxu2 %v1690_v17  ;;  %1683 = vmatmul.msk.f32.vlgmr.msra.gmra.mxu0 %vm497_vm1, %v486_v19  ;;  %v1709_v29 = vld [vmem:[%s1981_s21 + $0xa8] sm:$0xff]  ;;  %v1708_v33 = vld [vmem:[%s1981_s21 + $0xa0] sm:$0xff]  ;;  %v1728_v38 = vld [vmem:[%s1981_s21 + $0x110] sm:$0xff] }
  0x1b   : > { %609 = vmatpush.msra.mxu3 %v1696_v18  ;;  %1689 = vmatmul.msk.f32.vlgmr.msra.gmra.mxu1 %vm497_vm1, %v486_v19  ;;  %v1715_v30 = vld [vmem:[%s1981_s21 + $0xc8] sm:$0xff]  ;;  %v1714_v34 = vld [vmem:[%s1981_s21 + $0xc0] sm:$0xff]  ;;  %v1734_v47 = vld [vmem:[%s2400_s4 + $0x38] sm:$0xff] }
  0x1c   : > { %1695 = vmatmul.msk.f32.vlgmr.msra.gmra.mxu2 %vm497_vm1, %v486_v19  ;;  %1701 = vmatmul.msk.f32.vlgmr.msra.gmra.mxu3 %vm497_vm1, %v486_v19  ;;  %v1721_v31 = vld [vmem:[%s1981_s21 + $0xe8] sm:$0xff]  ;;  %v1720_v35 = vld [vmem:[%s1981_s21 + $0xe0] sm:$0xff]  ;;  %v772_v48 = vld [vmem:[%s2400_s4 + $0x30] sm:$0x1] }
  0x1d   : > { %1706 = vmatpush.msk.msrb.mxu0 %vm501_vm0, %v1705_v20  ;;  %1712 = vmatpush.msk.msrb.mxu1 %vm501_vm0, %v1711_v21  ;;  %v1727_v39 = vld [vmem:[%s1981_s21 + $0x108] sm:$0xff]  ;;  %v1726_v40 = vld [vmem:[%s1981_s21 + $0x100] sm:$0xff]  ;;  %v1771_v49 = vld [vmem:[%s2400_s4 + $0xd8] sm:$0x1]  ;;  %s485_s21 = scalar_lea.vmem %s2410_s14, %s2412_s16 }
  0x1e   : > { %1718 = vmatpush.msk.msrb.mxu2 %vm501_vm0, %v1717_v22  ;;  %1724 = vmatpush.msk.msrb.mxu3 %vm501_vm0, %v1723_v23  ;;  %v771_v50 = vld [vmem:[%s2400_s4 + $0x28] sm:$0xff]  ;;  %v1770_v51 = vld [vmem:[%s2400_s4 + $0xd0] sm:$0xff]  ;;  %v770_v52 = vld [vmem:[%s2400_s4 + $0x20] sm:$0xff] }
  0x1f   : > { %637 = vmatpush.msrb.mxu0 %v1704_v24  ;;  %667 = vmatpush.msrb.mxu1 %v1710_v25  ;;  %v1769_v53 = vld [vmem:[%s2400_s4 + $0xc8] sm:$0xff]  ;;  %v769_v54 = vld [vmem:[%s2400_s4 + $0x18] sm:$0xff]  ;;  %v1768_v55 = vld [vmem:[%s2400_s4 + $0xc0] sm:$0xff] }
  0x20   : > { %697 = vmatpush.msrb.mxu2 %v1716_v26  ;;  %727 = vmatpush.msrb.mxu3 %v1722_v27  ;;  %v768_v56 = vld [vmem:[%s2400_s4 + $0x10] sm:$0xff]  ;;  %v1767_v57 = vld [vmem:[%s2400_s4 + $0xb8] sm:$0xff]  ;;  %v767_v58 = vld [vmem:[%s2400_s4 + $0x8] sm:$0xff] }
  0x21   : > { %638 = vmatpush.msrb.mxu0 %v1703_v28  ;;  %668 = vmatpush.msrb.mxu1 %v1709_v29  ;;  %v1766_v59 = vld [vmem:[%s2400_s4 + $0xb0] sm:$0xff]  ;;  %v766_v60 = vld [vmem:[%s2400_s4] sm:$0xff]  ;;  %v1765_v61 = vld [vmem:[%s2400_s4 + $0xa8] sm:$0xff] }
  0x22   : > { %698 = vmatpush.msrb.mxu2 %v1715_v30  ;;  %728 = vmatpush.msrb.mxu3 %v1721_v31 }
  0x23   : > { %639 = vmatpush.msrb.mxu0 %v1702_v32  ;;  %669 = vmatpush.msrb.mxu1 %v1708_v33 }
  0x24   : > { %699 = vmatpush.msrb.mxu2 %v1714_v34  ;;  %729 = vmatpush.msrb.mxu3 %v1720_v35  ;;  %v1799_v34 = vld [vmem:[%s2400_s4 + $0x148] sm:$0x1]  ;;  %v1798_v35 = vld [vmem:[%s2400_s4 + $0x140] sm:$0xff] }
  0x25   : > { %1707 = vmatmul.msk.f32.vlgmr.msrb.gmra.mxu0 %vm497_vm1, %v486_v19  ;;  %1713 = vmatmul.msk.f32.vlgmr.msrb.gmra.mxu1 %vm497_vm1, %v486_v19 }
  0x26   : > { %1719 = vmatmul.msk.f32.vlgmr.msrb.gmra.mxu2 %vm497_vm1, %v486_v19  ;;  %1725 = vmatmul.msk.f32.vlgmr.msrb.gmra.mxu3 %vm497_vm1, %v486_v19 }
  0x27   : > { %1730 = vmatpush.msk.msra.mxu0 %vm501_vm0, %v1729_v36  ;;  %1388 = vperm.xlu0 %1875, %v1380_v37   ;;  %v1797_v36 = vld [vmem:[%s2400_s4 + $0x138] sm:$0xff]  ;;  %v1796_v37 = vld [vmem:[%s2400_s4 + $0x130] sm:$0xff] }
  0x28   : > { %1741 = vmatpush.msk.msra.mxu2 %vm777_vm2, %v1740_v41  ;;  %1732 = vmatpush.msk.msra.mxu1 %vm777_vm2, %v772_v48  ;;  %v1827_v41 = vld [vmem:[%s2400_s4 + $0x1b8] sm:$0x1]  ;;  %v801_v48 = vld [vmem:[%s2401_s5] sm:$0xff] }
  0x29   : > { %757 = vmatpush.msra.mxu0 %v1728_v38  ;;  %v1795_v38 = vld [vmem:[%s2400_s4 + $0x128] sm:$0xff] }
  0x2a   : > { %824 = vmatpush.msra.mxu2 %v1739_v42  ;;  %791 = vmatpush.msra.mxu1 %v771_v50  ;;  %v1826_v42 = vld [vmem:[%s2400_s4 + $0x1b0] sm:$0xff] }
  0x2b   : > { %758 = vmatpush.msra.mxu0 %v1727_v39  ;;  %v1794_v39 = vld [vmem:[%s2400_s4 + $0x120] sm:$0xff]  ;;  %v1743_v50 = vld [vmem:[%s2401_s5 + $0x10] sm:$0xff] }
  0x2c   : > { %825 = vmatpush.msra.mxu2 %v1738_v43  ;;  %792 = vmatpush.msra.mxu1 %v770_v52  ;;  %v1825_v43 = vld [vmem:[%s2400_s4 + $0x1a8] sm:$0xff]  ;;  %v1757_v52 = vld [vmem:[%s2400_s4 + $0xa0] sm:$0x1] }
  0x2d   : > { %759 = vmatpush.msra.mxu0 %v1726_v40  ;;  %v1793_v40 = vld [vmem:[%s2400_s4 + $0x118] sm:$0xff] }
  0x2e   : > { %1731 = vmatmul.msk.f32.vlgmr.msra.gmra.mxu0 %vm497_vm1, %v486_v19  ;;  %826 = vmatpush.msra.mxu2 %v1737_v44  ;;  %v1824_v44 = vld [vmem:[%s2400_s4 + $0x1a0] sm:$0xff] }
  0x2f   : > { %793 = vmatpush.msra.mxu1 %v769_v54  ;;  %v1756_v54 = vld [vmem:[%s2400_s4 + $0x98] sm:$0xff] }
  0x30   : > { %827 = vmatpush.msra.mxu2 %v1736_v45  ;;  %v1823_v45 = vld [vmem:[%s2400_s4 + $0x198] sm:$0xff] }
  0x31   : > { %794 = vmatpush.msra.mxu1 %v768_v56  ;;  %v1754_v56 = vld [vmem:[%s2400_s4 + $0x88] sm:$0xff] }
  0x32   : > { %828 = vmatpush.msra.mxu2 %v1735_v46  ;;  %v1822_v46 = vld [vmem:[%s2400_s4 + $0x190] sm:$0xff] }
  0x33   : > { %795 = vmatpush.msra.mxu1 %v767_v58  ;;  %v1813_v58 = vld [vmem:[%s2400_s4 + $0x180] sm:$0x1] }
  0x34   : > { %829 = vmatpush.msra.mxu2 %v1734_v47  ;;  %v1821_v47 = vld [vmem:[%s2400_s4 + $0x188] sm:$0xff] }
  0x35   : > { %796 = vmatpush.msra.mxu1 %v766_v60  ;;  %v1753_v60 = vld [vmem:[%s2400_s4 + $0x80] sm:$0xff] }
  0x36   : > { %1772 = vmatpush.msk.msrb.mxu2 %vm777_vm2, %v1771_v49 }
  0x38   : > { %992 = vmatpush.msrb.mxu2 %v1770_v51 }
  0x3a   : > { %993 = vmatpush.msrb.mxu2 %v1769_v53  ;;  %v802_v53 = vld [vmem:[%s2401_s5 + $0x8] sm:$0xf] }
  0x3c   : > { %994 = vmatpush.msrb.mxu2 %v1768_v55  ;;  %v1755_v55 = vld [vmem:[%s2400_s4 + $0x90] sm:$0xff] }
  0x3e   : > { %995 = vmatpush.msrb.mxu2 %v1767_v57  ;;  %v1744_v57 = vld [vmem:[%s2401_s5 + $0x18] sm:$0xf] }
  0x40   : > { %996 = vmatpush.msrb.mxu2 %v1766_v59 }
  0x42   : > { %997 = vmatpush.msrb.mxu2 %v1765_v61  ;;  %v1774_v61 = vld [vmem:[%s2401_s5 + $0x30] sm:$0xff] }
  0x81   : > { %v495_v0 = vpop.permute.xlu0 %494 }
  0x97   : > { %v522_v62 = vpop.f32.mrf.mxu0 }
  0x98   : > { %v551_v63 = vpop.f32.mrf.mxu1  ;;  %v523_v1 = vadd.f32 %v522_v62, %v495_v0  ;;  %v1752_v62 = vld [vmem:[%s2400_s4 + $0x78] sm:$0xff] }
  0x99   : > { %v552_v2 = vadd.f32 %v551_v63, %v495_v0  ;;  %v1812_v63 = vld [vmem:[%s2400_s4 + $0x178] sm:$0xff] }
  0x9a   : > { %v525_v3 = vmax.f32 %v523_v1, 0.0  ;;  %v1811_v1 = vld [vmem:[%s2400_s4 + $0x170] sm:$0xff] }
  0x9b   : > { %v554_v4 = vmax.f32 %v552_v2, 0.0  ;;  %v1810_v2 = vld [vmem:[%s2400_s4 + $0x168] sm:$0xff] }
  0x9d   : > { %v555_v9 = vmax.f32 %v525_v3, %v554_v4  ;;  %v1809_v3 = vld [vmem:[%s2400_s4 + $0x160] sm:$0xff]  ;;  %v1775_v4 = vld [vmem:[%s2401_s5 + $0x38] sm:$0xf] }
  0x9f   : > { %v581_v5 = vpop.f32.mrf.mxu2  ;;  %v611_v6 = vpop.f32.mrf.mxu3 }
  0xa0   : > { %v582_v7 = vadd.f32 %v581_v5, %v495_v0  ;;  %v612_v8 = vadd.f32 %v611_v6, %v495_v0  ;;  %v1808_v5 = vld [vmem:[%s2400_s4 + $0x158] sm:$0xff] }
  0xa2   : > { %v584_v10 = vmax.f32 %v582_v7, 0.0  ;;  %v641_v11 = vpop.f32.mrf.mxu0  ;;  %v671_v12 = vpop.f32.mrf.mxu1  ;;  %v614_v15 = vmax.f32 %v612_v8, 0.0  ;;  %v1807_v7 = vld [vmem:[%s2400_s4 + $0x150] sm:$0xff] }
  0xa3   : > { %v642_v13 = vadd.f32 %v641_v11, %v495_v0  ;;  %v672_v16 = vadd.f32 %v671_v12, %v495_v0 }
  0xa4   : > { %v585_v14 = vmax.f32 %v555_v9, %v584_v10 }
  0xa5   : > { %v644_v18 = vmax.f32 %v642_v13, 0.0  ;;  %v674_v20 = vmax.f32 %v672_v16, 0.0 }
  0xa6   : > { %v615_v17 = vmax.f32 %v585_v14, %v614_v15  ;;  %v1760_v15 = vld [vmem:[%s2401_s5 + $0x20] sm:$0xff] }
  0xa8   : > { %v645_v19 = vmax.f32 %v615_v17, %v644_v18  ;;  %v1785_v17 = vld [vmem:[%s2400_s4 + $0x110] sm:$0x1]  ;;  %v1784_v18 = vld [vmem:[%s2400_s4 + $0x108] sm:$0xff] }
  0xa9   : > { %v701_v21 = vpop.f32.mrf.mxu2  ;;  %v731_v22 = vpop.f32.mrf.mxu3 }
  0xaa   : > { %v675_v23 = vmax.f32 %v645_v19, %v674_v20  ;;  %v702_v24 = vadd.f32 %v701_v21, %v495_v0  ;;  %v732_v25 = vadd.f32 %v731_v22, %v495_v0  ;;  %v1783_v19 = vld [vmem:[%s2400_s4 + $0x100] sm:$0xff]  ;;  %v1782_v20 = vld [vmem:[%s2400_s4 + $0xf8] sm:$0xff]  ;;  %v1761_v21 = vld [vmem:[%s2401_s5 + $0x28] sm:$0xf] }
  0xab   : > { %v761_v26 = vpop.f32.mrf.mxu0  ;;  %v1781_v22 = vld [vmem:[%s2400_s4 + $0xf0] sm:$0xff] }
  0xac   : > { %v704_v27 = vmax.f32 %v702_v24, 0.0  ;;  %v762_v28 = vadd.f32 %v761_v26, %v495_v0  ;;  %v734_v30 = vmax.f32 %v732_v25, 0.0  ;;  %v1751_v0 = vld [vmem:[%s2400_s4 + $0x70] sm:$0xff]  ;;  %v1779_v24 = vld [vmem:[%s2400_s4 + $0xe0] sm:$0xff]  ;;  %v1840_v26 = vld [vmem:[%s2400_s4 + $0x1e8] sm:$0xff] }
  0xad   : > { %v1841_v25 = vld [vmem:[%s2400_s4 + $0x1f0] sm:$0x1] }
  0xae   : > { %v705_v29 = vmax.f32 %v675_v23, %v704_v27  ;;  %v764_v32 = vmax.f32 %v762_v28, 0.0  ;;  %v1780_v23 = vld [vmem:[%s2400_s4 + $0xe8] sm:$0xff]  ;;  %v1839_v27 = vld [vmem:[%s2400_s4 + $0x1e0] sm:$0xff]  ;;  %v1838_v28 = vld [vmem:[%s2400_s4 + $0x1d8] sm:$0xff] }
  0xb0   : > { %v735_v31 = vmax.f32 %v705_v29, %v734_v30  ;;  %v1802_v29 = vld [vmem:[%s2401_s5 + $0x50] sm:$0xff] }
  0xb1   : > { %v1837_v30 = vld [vmem:[%s2400_s4 + $0x1d0] sm:$0xff] }
  0xb2   : > { %v2109_v33 = vmax.f32 %v735_v31, %v764_v32  ;;  %v1836_v31 = vld [vmem:[%s2400_s4 + $0x1c8] sm:$0xff]  ;;  %v1835_v32 = vld [vmem:[%s2400_s4 + $0x1c0] sm:$0xff] }
  0xb4   : > { %1733 = vmatmul.msk.f32.vlgmr.msra.gmra.mxu1 %vm773_vm3, %v2109_v33  ;;  %1742 = vmatmul.msk.f32.vlgmr.msra.gmra.mxu2 %vm773_vm3, %v2109_v33 }
  0xb5   : > { %1800 = vmatpush.msk.msra.mxu2 %vm777_vm2, %v1799_v34  ;;  %v1803_v34 = vld [vmem:[%s2401_s5 + $0x58] sm:$0xf] }
  0xb7   : > { %1128 = vmatpush.msra.mxu2 %v1798_v35 }
  0xb9   : > { %1129 = vmatpush.msra.mxu2 %v1797_v36 }
  0xbb   : > { %1130 = vmatpush.msra.mxu2 %v1796_v37 }
  0xbc   : > { %1773 = vmatmul.msk.f32.vlgmr.msrb.gmra.mxu2 %vm773_vm3, %v2109_v33 }
  0xbd   : > { %1131 = vmatpush.msra.mxu2 %v1795_v38 }
  0xbf   : > { %1132 = vmatpush.msra.mxu2 %v1794_v39 }
  0xc1   : > { %1133 = vmatpush.msra.mxu2 %v1793_v40 }
  0xc3   : > { %1828 = vmatpush.msk.msrb.mxu2 %vm777_vm2, %v1827_v41  ;;  %v1830_v41 = vld [vmem:[%s2401_s5 + $0x70] sm:$0xff] }
  0xc4   : > { %1801 = vmatmul.msk.f32.vlgmr.msra.gmra.mxu2 %vm773_vm3, %v2109_v33 }
  0xc5   : > { %1264 = vmatpush.msrb.mxu2 %v1826_v42  ;;  %v1788_v42 = vld [vmem:[%s2401_s5 + $0x40] sm:$0xff] }
  0xc7   : > { %1265 = vmatpush.msrb.mxu2 %v1825_v43 }
  0xc9   : > { %1266 = vmatpush.msrb.mxu2 %v1824_v44 }
  0xcb   : > { %1267 = vmatpush.msrb.mxu2 %v1823_v45  ;;  %v1379_v45 = vld [vmem:[%s2402_s6] sm:$0xff] }
  0xcc   : > { %1383 = vperm.xlu1 %1876, %v1379_v45  }
  0xcd   : > { %1268 = vmatpush.msrb.mxu2 %v1822_v46  ;;  %v1789_v46 = vld [vmem:[%s2401_s5 + $0x48] sm:$0xf] }
  0xcf   : > { %1269 = vmatpush.msrb.mxu2 %v1821_v47 }
  0xd0   : > { %1829 = vmatmul.msk.f32.vlgmr.msrb.gmra.mxu2 %vm773_vm3, %v2109_v33 }
 0x131   : > { %v798_v49 = vpop.f32.mrf.mxu1 }
 0x132   : > { %1748 = vmatpush.msk.msrb.mxu0 %vm844_vm4, %v798_v49 }
 0x133   : > { %1749 = vmatmul.msk.f32.vlgmr.msrb.gmra.mxu0 %vm837_vm5, %v801_v48  ;;  %v1816_v48 = vld [vmem:[%s2401_s5 + $0x60] sm:$0xff] }
 0x137   : > { %v831_v51 = vpop.f32.mrf.mxu2 }
 0x138   : > { %1745 = vmatpush.msk.msra.mxu3 %vm844_vm4, %v831_v51  ;;  %v1844_v51 = vld [vmem:[%s2401_s5 + $0x80] sm:$0xff] }
 0x139   : > { %1746 = vmatmul.msk.f32.vlgmr.msra.gmra.mxu3 %vm837_vm5, %v1743_v50  ;;  %v1817_v50 = vld [vmem:[%s2401_s5 + $0x68] sm:$0xf] }
 0x13a   : > { %1758 = vmatpush.msk.msrb.mxu3 %vm777_vm2, %v1757_v52 }
 0x13b   : > { %1750 = vmatmul.msk.f32.gmra.mxu0 %vm837_vm5, %v802_v53  ;;  %v1845_v53 = vld [vmem:[%s2401_s5 + $0x88] sm:$0xf] }
 0x13c   : > { %924 = vmatpush.msrb.mxu3 %v1756_v54 }
 0x13e   : > { %925 = vmatpush.msrb.mxu3 %v1755_v55 }
 0x13f   : > { %v999_v59 = vpop.f32.mrf.mxu2 }
 0x140   : > { %1776 = vmatpush.msk.msra.mxu0 %vm844_vm4, %v999_v59  ;;  %926 = vmatpush.msrb.mxu3 %v1754_v56 }
 0x141   : > { %1747 = vmatmul.msk.f32.gmra.mxu3 %vm837_vm5, %v1744_v57 }
 0x142   : > { %1814 = vmatpush.msk.msrb.mxu0 %vm777_vm2, %v1813_v58  ;;  %927 = vmatpush.msrb.mxu3 %v1753_v60 }
 0x143   : > { %1777 = vmatmul.msk.f32.vlgmr.msra.gmra.mxu0 %vm837_vm5, %v1774_v61 }
 0x144   : > { %928 = vmatpush.msrb.mxu3 %v1752_v62  ;;  %1196 = vmatpush.msrb.mxu0 %v1812_v63 }
 0x146   : > { %929 = vmatpush.msrb.mxu3 %v1751_v0  ;;  %1197 = vmatpush.msrb.mxu0 %v1811_v1  ;;  %v1384_v1 = vpop.permute.xlu1 %1383 }
 0x147   : > { %v1135_v6 = vpop.f32.mrf.mxu2 }
 0x148   : > { %1198 = vmatpush.msrb.mxu0 %v1810_v2 }
 0x149   : > { %1759 = vmatmul.msk.f32.vlgmr.msrb.gmra.mxu3 %vm773_vm3, %v2109_v33 }
 0x14a   : > { %1199 = vmatpush.msrb.mxu0 %v1809_v3 }
 0x14b   : > { %1778 = vmatmul.msk.f32.gmra.mxu0 %vm837_vm5, %v1775_v4 }
 0x14c   : > { %1200 = vmatpush.msrb.mxu0 %v1808_v5 }
 0x14e   : > { %1201 = vmatpush.msrb.mxu0 %v1807_v7 }
 0x153   : > { %v1271_v8 = vpop.f32.mrf.mxu2  ;;  %1815 = vmatmul.msk.f32.vlgmr.msrb.gmra.mxu0 %vm773_vm3, %v2109_v33 }
 0x154   : > { %1832 = vmatpush.msk.msra.mxu0 %vm844_vm4, %v1271_v8 }
 0x15b   : > { %1833 = vmatmul.msk.f32.vlgmr.msra.gmra.mxu0 %vm837_vm5, %v1830_v41 }
 0x1b0   : > { %v897_v9 = vpop.f32.mrf.mxu0 }
 0x1b8   : > { %v900_v12 = vpop.f32.mrf.mxu0 }
 0x1bc   : > { %v865_v10 = vpop.f32.mrf.mxu3 }
 0x1bd   : > { %v898_v11 = vadd.f32 %v897_v9, %v865_v10 }
 0x1c0   : > { %v1031_v35 = vpop.f32.mrf.mxu0 }
 0x1c4   : > { %v868_v13 = vpop.f32.mrf.mxu3 }
 0x1c5   : > { %v901_v14 = vadd.f32 %v900_v12, %v868_v13 }
 0x1c8   : > { %v1034_v38 = vpop.f32.mrf.mxu0 }
 0x1cc   : > { %v931_v16 = vpop.f32.mrf.mxu3 }
 0x1cd   : > { %1762 = vmatpush.msk.msrb.mxu1 %vm844_vm4, %v931_v16 }
 0x1ce   : > { %1763 = vmatmul.msk.f32.vlgmr.msrb.gmra.mxu1 %vm837_vm5, %v1760_v15 }
 0x1cf   : > { %1786 = vmatpush.msk.msra.mxu1 %vm777_vm2, %v1785_v17 }
 0x1d0   : > { %v1203_v44 = vpop.f32.mrf.mxu0 }
 0x1d1   : > { %1060 = vmatpush.msra.mxu1 %v1784_v18  ;;  %v1406_v18 = vld [vmem:[%s482_s28 + $0x18] sm:$0xff] }
 0x1d3   : > { %1061 = vmatpush.msra.mxu1 %v1783_v19  ;;  %v1405_v19 = vld [vmem:[%s482_s28 + $0x10] sm:$0xff] }
 0x1d5   : > { %1062 = vmatpush.msra.mxu1 %v1782_v20  ;;  %v1530_v20 = vmul.f32 %v1406_v18, %v1406_v18 }
 0x1d6   : > { %1764 = vmatmul.msk.f32.gmra.mxu1 %vm837_vm5, %v1761_v21  ;;  %v1404_v21 = vld [vmem:[%s482_s28 + $0x8] sm:$0xff] }
 0x1d7   : > { %1063 = vmatpush.msra.mxu1 %v1781_v22  ;;  %v1403_v22 = vld [vmem:[%s482_s28] sm:$0xff] }
 0x1d8   : > { %v1303_v60 = vpop.f32.mrf.mxu0 }
 0x1d9   : > { %1064 = vmatpush.msra.mxu1 %v1780_v23  ;;  %v1529_v23 = vmul.f32 %v1405_v19, %v1405_v19 }
 0x1db   : > { %1065 = vmatpush.msra.mxu1 %v1779_v24  ;;  %v1528_v24 = vmul.f32 %v1404_v21, %v1404_v21 }
 0x1dd   : > { %1804 = vmatpush.msk.msrb.mxu1 %vm844_vm4, %v1135_v6 }
 0x1de   : > { %1787 = vmatmul.msk.f32.vlgmr.msra.gmra.mxu1 %vm773_vm3, %v2109_v33 }
 0x1df   : > { %1842 = vmatpush.msk.msra.mxu1 %vm777_vm2, %v1841_v25  ;;  %v1407_v25 = vld [vmem:[%s2407_s11] sm:$0x1] }
 0x1e1   : > { %1332 = vmatpush.msra.mxu1 %v1840_v26  ;;  %v1527_v26 = vmul.f32 %v1403_v22, %v1403_v22 }
 0x1e3   : > { %1333 = vmatpush.msra.mxu1 %v1839_v27  ;;  %v1525_v27 = vld [vmem:[%s2405_s9] sm:$0xff] }
 0x1e5   : > { %1334 = vmatpush.msra.mxu1 %v1838_v28  ;;  %v1526_v28 = vld [vmem:[%s2405_s9 + $0x8] sm:$0xf] }
 0x1e6   : > { %1805 = vmatmul.msk.f32.vlgmr.msrb.gmra.mxu1 %vm837_vm5, %v1802_v29 }
 0x1e7   : > { %1335 = vmatpush.msra.mxu1 %v1837_v30 }
 0x1e9   : > { %1336 = vmatpush.msra.mxu1 %v1836_v31 }
 0x1eb   : > { %1337 = vmatpush.msra.mxu1 %v1835_v32  ;;  %v1408_v32 = vld [vmem:[%s2408_s12] sm:$0x1] }
 0x1ed   : > { %1453 = vmatpush.msrb.mxu1 %v1406_v18 }
 0x1ee   : > { %1806 = vmatmul.msk.f32.gmra.mxu1 %vm837_vm5, %v1803_v34  ;;  %v1465_v34 = vld [vmem:[%s2404_s8] sm:$0xff] }
 0x1ef   : > { %1454 = vmatpush.msrb.mxu1 %v1405_v19 }
 0x1f1   : > { %1455 = vmatpush.msrb.mxu1 %v1404_v21 }
 0x1f3   : > { %1456 = vmatpush.msrb.mxu1 %v1403_v22 }
 0x1f6   : > { %1843 = vmatmul.msk.f32.vlgmr.msra.gmra.mxu1 %vm773_vm3, %v2109_v33  ;;  %v1831_v33 = vld [vmem:[%s2401_s5 + $0x78] sm:$0xf] }
 0x1f7   : > { %1834 = vmatmul.msk.f32.gmra.mxu0 %vm837_vm5, %v1831_v33 }
 0x1fe   : > { %1851 = vmatmul.msk.f32.vlgmr.msrb.gmra.mxu1 %vm1437_vm8, %v1407_v25 }
 0x24b   : > { %v963_v36 = vpop.f32.mrf.mxu1 }
 0x24c   : > { %v969_v37 = vadd.f32 %v963_v36, %v898_v11  ;;  %v1531_v36 = vld [vmem:[%s2406_s10] sm:$0xff] }
 0x24e   : > { %v1037_v56 = vadd.f32 %v1031_v35, %v969_v37  ;;  %v1463_v37 = vld [vmem:[%s2403_s7] sm:$0xff] }
 0x253   : > { %v966_v39 = vpop.f32.mrf.mxu1 }
 0x254   : > { %v970_v40 = vadd.f32 %v966_v39, %v901_v14  ;;  %v1389_v14 = vpop.permute.xlu0 %1388  ;;  %v1532_v39 = vld [vmem:[%s2406_s10 + $0x8] sm:$0xf] }
 0x256   : > { %v1038_v61 = vadd.f32 %v1034_v38, %v970_v40  ;;  %v1466_v38 = vld [vmem:[%s2404_s8 + $0x8] sm:$0xf] }
 0x257   : > { %v1464_v40 = vld [vmem:[%s2403_s7 + $0x8] sm:$0xf] }
 0x25b   : > { %v1067_v43 = vpop.f32.mrf.mxu1 }
 0x25c   : > { %1790 = vmatpush.msk.msra.mxu3 %vm844_vm4, %v1067_v43 }
 0x25d   : > { %1791 = vmatmul.msk.f32.vlgmr.msra.gmra.mxu3 %vm837_vm5, %v1788_v42 }
 0x25e   : > { %1818 = vmatpush.msk.msrb.mxu3 %vm844_vm4, %v1203_v44 }
 0x263   : > { %v1167_v47 = vpop.f32.mrf.mxu1 }
 0x265   : > { %1792 = vmatmul.msk.f32.gmra.mxu3 %vm837_vm5, %v1789_v46 }
 0x26b   : > { %v1170_v49 = vpop.f32.mrf.mxu1 }
 0x26d   : > { %1819 = vmatmul.msk.f32.vlgmr.msrb.gmra.mxu3 %vm837_vm5, %v1816_v48 }
 0x273   : > { %v1339_v52 = vpop.f32.mrf.mxu1 }
 0x274   : > { %1846 = vmatpush.msk.msra.mxu2 %vm844_vm4, %v1339_v52  ;;  %v1306_v8 = vpop.f32.mrf.mxu0 }
 0x275   : > { %1820 = vmatmul.msk.f32.gmra.mxu3 %vm837_vm5, %v1817_v50  ;;  %1847 = vmatmul.msk.f32.vlgmr.msra.gmra.mxu2 %vm837_vm5, %v1844_v51 }
 0x276   : > { %1585 = vmatpush.msrb.mxu2 %v1530_v20 }
 0x278   : > { %1586 = vmatpush.msrb.mxu2 %v1529_v23 }
 0x27a   : > { %1587 = vmatpush.msrb.mxu2 %v1528_v24 }
 0x27b   : > { %v1458_v41 = vpop.f32.mrf.mxu1 }
 0x27c   : > { %1588 = vmatpush.msrb.mxu2 %v1527_v26 }
 0x27d   : > { %1848 = vmatmul.msk.f32.gmra.mxu2 %vm837_vm5, %v1845_v53 }
 0x285   : > { %1860 = vmatmul.msk.f32.vlgmr.msrb.gmra.mxu2 %vm1437_vm8, %v1525_v27 }
 0x28d   : > { %1861 = vmatmul.msk.f32.gmra.mxu2 %vm1437_vm8, %v1526_v28 }
 0x2e0   : > { %v1099_v54 = vpop.f32.mrf.mxu3 }
 0x2e1   : > { %v1105_v57 = vadd.f32 %v1099_v54, %v1037_v56 }
 0x2e3   : > { %v1173_v59 = vadd.f32 %v1167_v47, %v1105_v57 }
 0x2e8   : > { %v1102_v55 = vpop.f32.mrf.mxu3 }
 0x2e9   : > { %v1106_v63 = vadd.f32 %v1102_v55, %v1038_v61 }
 0x2eb   : > { %v1174_v4 = vadd.f32 %v1170_v49, %v1106_v63 }
 0x2f0   : > { %v1235_v58 = vpop.f32.mrf.mxu3 }
 0x2f1   : > { %v1241_v62 = vadd.f32 %v1235_v58, %v1173_v59 }
 0x2f3   : > { %v1309_v0 = vadd.f32 %v1303_v60, %v1241_v62 }
 0x2f8   : > { %v1238_v2 = vpop.f32.mrf.mxu3  ;;  %v1371_v3 = vpop.f32.mrf.mxu2 }
 0x2f9   : > { %v1377_v5 = vadd.f32 %v1371_v3, %v1309_v0  ;;  %v1242_v6 = vadd.f32 %v1238_v2, %v1174_v4  ;;  %v1461_v3 = vld [vmem:[#allocation2] sm:$0x1] }
 0x2fb   : > { %v1391_v7 = vadd.f32 %v1384_v1, %v1377_v5  ;;  %v1310_v10 = vadd.f32 %v1306_v8, %v1242_v6 }
 0x2fd   : > { %v1393_v9 = vmax.f32 %v1391_v7, 0.0 }
 0x2ff   : > { %v1396_v11 = vsel %vm1395_vm6, %v1393_v9, -inf }
 0x300   : > { %v1374_v12 = vpop.f32.mrf.mxu2  ;;  %1397 = vmax.xlane.f32.xlu2 %v1396_v11 }
 0x301   : > { %v1378_v13 = vadd.f32 %v1374_v12, %v1310_v10 }
 0x303   : > { %v1392_v15 = vadd.f32 %v1389_v14, %v1378_v13 }
 0x305   : > { %v1394_v16 = vmax.f32 %v1392_v15, 0.0 }
 0x307   : > { %v1400_v17 = vsel %vm1399_vm7, %v1394_v16, -inf }
 0x308   : > { %1401 = vmax.xlane.f32.xlu1 %v1400_v17  ;;  %v1590_v43 = vpop.f32.mrf.mxu2 }
 0x310   : > { %v1593_v47 = vpop.f32.mrf.mxu2 }
 0x373   : > { %v1398_v30 = vpop.xlane.xlu2 %1397 }
 0x374   : > { %v1533_v35 = vmul.f32 %v1398_v30, %v1398_v30 }
 0x37b   : > { %v1402_v29 = vpop.xlane.xlu1 %1401 }
 0x37c   : > { %v1534_v31 = vmul.f32 %v1402_v29, %v1402_v29  ;;  %1849 = vmatpush.msk.msra.mxu3 %vm1413_vm9, %v1402_v29  ;;  %1852 = vmatpush.msk.msrb.mxu0 %vm1413_vm9, %v1402_v29 }
 0x37e   : > { %1432 = vmatpush.msra.mxu3 %v1398_v30  ;;  %1488 = vmatpush.msrb.mxu0 %v1398_v30 }
 0x37f   : > { %1857 = vmatpush.msk.msra.mxu1 %vm1413_vm9, %v1534_v31  ;;  %1850 = vmatmul.msk.f32.vlgmr.msra.gmra.mxu3 %vm1409_vm10, %v1408_v32 }
 0x380   : > { %1514 = vmatpush.msrb.mxu3 %v1406_v18  ;;  %1853 = vmatmul.msk.f32.vlgmr.msrb.gmra.mxu0 %vm1409_vm10, %v1465_v34 }
 0x381   : > { %1559 = vmatpush.msra.mxu1 %v1533_v35 }
 0x382   : > { %1515 = vmatpush.msrb.mxu3 %v1405_v19  ;;  %1858 = vmatmul.msk.f32.vlgmr.msra.gmra.mxu1 %vm1409_vm10, %v1531_v36 }
 0x384   : > { %1516 = vmatpush.msrb.mxu3 %v1404_v21 }
 0x386   : > { %1517 = vmatpush.msrb.mxu3 %v1403_v22 }
 0x387   : > { %1855 = vmatmul.msk.f32.vlgmr.msrb.gmra.mxu3 %vm1437_vm8, %v1463_v37 }
 0x388   : > { %1854 = vmatmul.msk.f32.gmra.mxu0 %vm1409_vm10, %v1466_v38 }
 0x38a   : > { %1859 = vmatmul.msk.f32.gmra.mxu1 %vm1409_vm10, %v1532_v39 }
 0x38f   : > { %1856 = vmatmul.msk.f32.gmra.mxu3 %vm1437_vm8, %v1464_v40 }
 0x3fd   : > { %v1490_v33 = vpop.f32.mrf.mxu0 }
 0x3ff   : > { %v1561_v44 = vpop.f32.mrf.mxu1 }
 0x400   : > { %v1591_v51 = vadd.f32 %v1590_v43, %v1561_v44 }
 0x402   : > { %v1434_v42 = vpop.f32.mrf.mxu3 }
 0x403   : > { %v1459_v1 = vadd.f32 %v1458_v41, %v1434_v42 }
 0x405   : > { %v1493_v48 = vpop.f32.mrf.mxu0  ;;  %v1462_v5 = vadd.f32 %v1461_v3, %v1459_v1 }
 0x407   : > { %v1564_v49 = vpop.f32.mrf.mxu1 }
 0x408   : > { %v1594_v54 = vadd.f32 %v1593_v47, %v1564_v49 }
 0x40a   : > { %v1519_v45 = vpop.f32.mrf.mxu3 }
 0x40b   : > { %v1520_v46 = vadd.f32 %v1519_v45, %v1490_v33 }
 0x40d   : > { %v1596_v50 = vmul.f32 %v1520_v46, %v1520_v46 }
 0x40f   : > { %v1598_v55 = vadd.f32 %v1596_v50, %v1591_v51 }
 0x411   : > { %v1601_v58 = vsel %vm1600_vm11, %v1598_v55, 0.0 }
 0x412   : > { %v1522_v52 = vpop.f32.mrf.mxu3 }
 0x413   : > { %v1523_v53 = vadd.f32 %v1522_v52, %v1493_v48 }
 0x415   : > { %v1597_v56 = vmul.f32 %v1523_v53, %v1523_v53 }
 0x417   : > { %v1599_v57 = vadd.f32 %v1597_v56, %v1594_v54 }
 0x419   : > { %v1603_v59 = vsel %vm1602_vm12, %v1599_v57, 0.0 }
 0x41a   : > { %v1604_v60 = vadd.f32 %v1603_v59, %v1601_v58 }
 0x41c   : > { %v1605_v61 = vrot.slane %v1604_v60, 4 }
 0x41e   : > { %v1606_v62 = vadd.f32 %v1605_v61, %v1604_v60 }
 0x420   : > { %v1607_v63 = vrot.slane %v1606_v62, 2 }
 0x422   : > { %v1608_v0 = vadd.f32 %v1607_v63, %v1606_v62 }
 0x424   : > { %v1609_v2 = vrot.slane %v1608_v0, 1 }
 0x426   : > { %v1610_v4 = vadd.f32 %v1609_v2, %v1608_v0 }
 0x428   : > { %v1611_v6 = vmul.f32 0.5, %v1610_v4 }
 0x42a   : > { %v1612_v7 = vadd.f32 %v1611_v6, %v1462_v5 }
 0x42c   : > { %1614 = vst.msk [vmem:[%s485_s21] sm:$0x1] %vm1613_vm13, %v1612_v7 }
 0x42d PF: > { %s26_s15 = sadd.s32 1, %s1883_s15  }
 0x42e   : > { %p23_p4 = scmp.ge.s32.totalorder %s26_s15, 4  }
 0x430   :  { %25 = sbr.rel (!%p23_p4) target bundleno = 3 (0x3), region = 133 }

</bundles_post_ra>
